<compile_context>
chip_gen: v7x
topology: tpu7x:2x2x1
jax: 0.10.0
libtpu: 0.0.40
codegen_flags: <defaults>
</compile_context>

<pallas_src>
import functools

import jax
import jax.numpy as jnp
from jax.experimental import pallas as pl
from jax.experimental.pallas import tpu as pltpu


KSIZE = 5
STRIDE = 2


def _conv_out(size):
    return (size - (KSIZE - 1) - 1) // STRIDE + 1


def _fullblock(shape):
    zeros = (0,) * len(shape)
    return pl.BlockSpec(shape, lambda *_: zeros)


# ----------------------------------------------------------------------------
# Kernel A: conv1 GEMM (BN scale pre-folded into weights) + shift + ReLU.
# Rows of the patch matrix / output are ordered (h1, w1, b); tiled over rows.
# ----------------------------------------------------------------------------
def _conv1_kernel(p_ref, w_ref, s_ref, o_ref):
    # p: (tm, K1) bf16, w: (K1, C1) bf16, s: (1, C1) f32 -> o: (tm, C1) bf16
    acc = jnp.dot(p_ref[...], w_ref[...], preferred_element_type=jnp.float32)
    o_ref[...] = jnp.maximum(acc + s_ref[...], 0.0).astype(o_ref.dtype)


def _conv1_call(p1, w_mat, shift_row):
    m1, k1 = p1.shape
    c1 = w_mat.shape[1]
    if m1 % 512 == 0:
        tm = 512
    elif m1 % 256 == 0:
        tm = 256
    elif m1 % 128 == 0:
        tm = 128
    else:
        tm = m1                      # small problem: single full block
    return pl.pallas_call(
        _conv1_kernel,
        out_shape=jax.ShapeDtypeStruct((m1, c1), jnp.bfloat16),
        grid=(m1 // tm,),
        in_specs=[pl.BlockSpec((tm, k1), lambda i: (i, 0)),
                  pl.BlockSpec((k1, c1), lambda i: (0, 0)),
                  pl.BlockSpec((1, c1), lambda i: (0, 0))],
        out_specs=pl.BlockSpec((tm, c1), lambda i: (i, 0)),
        compiler_params=pltpu.CompilerParams(
            dimension_semantics=("parallel",)),
    )(p1, w_mat, shift_row)


# ----------------------------------------------------------------------------
# Kernel B: conv2 GEMM + conv3 + head, fully fused (everything stays in VMEM).
# conv2 patches arrive with rows ordered (h2, w2, b), so each conv3 tap is a
# contiguous static slice of `batch` rows (no strided / dynamic indexing).
# The head weight is pre-permuted to consume (conv3-position, channel) order,
# which makes PyTorch's NCHW x.view(N, -1) flatten implicit.
# ----------------------------------------------------------------------------
def _tail_kernel(p2_ref, w2_ref, s2_ref, w3_ref, s3_ref, wh_ref, bh_ref, o_ref,
                 *, batch, w2_out, h3_out, w3_out):
    # conv2: (H2*W2*B, K2) @ (K2, C2) -> +shift -> ReLU (f32 epilogue, bf16 reuse)
    a2 = jnp.dot(p2_ref[...], w2_ref[...], preferred_element_type=jnp.float32)
    a2 = jnp.maximum(a2 + s2_ref[...], 0.0).astype(jnp.bfloat16)

    n_out = o_ref.shape[1]
    c3 = w3_ref.shape[2]
    head = jnp.zeros((batch, n_out), jnp.float32)
    for q in range(h3_out * w3_out):            # conv3 output positions (static)
        oh, ow = q // w3_out, q % w3_out
        acc3 = jnp.zeros((batch, c3), jnp.float32)
        for ki in range(KSIZE):
            for kj in range(KSIZE):
                r0 = ((STRIDE * oh + ki) * w2_out + (STRIDE * ow + kj)) * batch
                acc3 = acc3 + jnp.dot(a2[r0:r0 + batch, :],
                                      w3_ref[ki * KSIZE + kj],
                                      preferred_element_type=jnp.float32)
        act3 = jnp.maximum(acc3 + s3_ref[...], 0.0).astype(jnp.bfloat16)
        head = head + jnp.dot(act3, wh_ref[q], preferred_element_type=jnp.float32)
    o_ref[...] = head + bh_ref[...]


def _tail_call(p2, w2_mat, shift2, w3_r, shift3, wh_r, bias_h,
               *, batch, w2_out, h3_out, w3_out):
    n_out = bias_h.shape[1]
    kernel = functools.partial(_tail_kernel, batch=batch, w2_out=w2_out,
                               h3_out=h3_out, w3_out=w3_out)
    return pl.pallas_call(
        kernel,
        out_shape=jax.ShapeDtypeStruct((batch, n_out), jnp.float32),
        in_specs=[_fullblock(p2.shape), _fullblock(w2_mat.shape),
                  _fullblock(shift2.shape), _fullblock(w3_r.shape),
                  _fullblock(shift3.shape), _fullblock(wh_r.shape),
                  _fullblock(bias_h.shape)],
        out_specs=_fullblock((batch, n_out)),
    )(p2, w2_mat, shift2, w3_r, shift3, wh_r, bias_h)


# ----------------------------------------------------------------------------
# Plain-JAX glue: im2col on a (H, W, B, C)-ordered feature map.
# Rows of the patch matrix come out ordered (oh, ow, b); columns (ki, kj, c).
# No transposes anywhere: just strided slices + a reshape (XLA fuses these).
# ----------------------------------------------------------------------------
def _im2col_hwbc(x_hwbc):
    h, w, b, c = x_hwbc.shape
    ho, wo = _conv_out(h), _conv_out(w)
    cols = []
    for i in range(KSIZE):
        for j in range(KSIZE):
            cols.append(x_hwbc[i:i + STRIDE * (ho - 1) + 1:STRIDE,
                               j:j + STRIDE * (wo - 1) + 1:STRIDE, :, :])
    p = jnp.stack(cols, axis=3)                    # (Ho, Wo, B, k*k, C)
    return p.reshape(ho * wo * b, KSIZE * KSIZE * c), (ho, wo)


# ----------------------------------------------------------------------------
# One-time parameter preparation (outside the jitted forward):
# fold eval-mode BN into the GEMM weights, cast to bf16, permute head weight.
# ----------------------------------------------------------------------------
def prepare_params(params, eps=1e-5):
    def bn_fold(bias, gamma, beta, mean, var):
        scale = gamma / jnp.sqrt(var + eps)
        shift = beta + (bias - mean) * scale
        return scale.astype(jnp.float32), shift.astype(jnp.float32)

    def conv_mat(w, scale):
        cout, cin, k, _ = w.shape
        m = jnp.transpose(w, (2, 3, 1, 0)).reshape(k * k * cin, cout)  # K=(ki,kj,ci)
        return (m * scale[None, :]).astype(jnp.bfloat16)

    w1, b1, g1, be1, m1, v1 = params["conv1"]
    w2, b2, g2, be2, m2, v2 = params["conv2"]
    w3, b3, g3, be3, m3, v3 = params["conv3"]
    wh, bh = params["head"]

    s1, sh1 = bn_fold(b1, g1, be1, m1, v1)
    s2, sh2 = bn_fold(b2, g2, be2, m2, v2)
    s3, sh3 = bn_fold(b3, g3, be3, m3, v3)

    c1, c2, c3 = w1.shape[0], w2.shape[0], w3.shape[0]
    n_out, feat = wh.shape
    p3 = feat // c3                                   # = H3 * W3

    return {
        "w1_mat": conv_mat(w1, s1),                   # (K1, C1)        bf16
        "shift1": sh1.reshape(1, c1),                 # (1, C1)         f32
        "w2_mat": conv_mat(w2, s2),                   # (K2, C2)        bf16
        "shift2": sh2.reshape(1, c2),                 # (1, C2)         f32
        "w3_r": conv_mat(w3, s3).reshape(KSIZE * KSIZE, w3.shape[1], c3),  # (25,C2,C3)
        "shift3": sh3.reshape(1, c3),                 # (1, C3)         f32
        # wh_r[q, c, o] = W_head[o, c*(H3*W3) + q]  (NCHW flatten absorbed here)
        "wh_r": jnp.transpose(wh.reshape(n_out, c3, p3), (2, 1, 0)).astype(jnp.bfloat16),
        "bias_h": bh.reshape(1, n_out).astype(jnp.float32),
    }


# ----------------------------------------------------------------------------
# Forward pass (2 pallas_calls total).
# ----------------------------------------------------------------------------
def dqn_forward(x_nchw, prep):
    batch = x_nchw.shape[0]
    c1 = prep["w1_mat"].shape[1]

    # NCHW -> (H, W, B, C): the ONLY transpose in the whole forward (6 KiB).
    x_hwbc = jnp.transpose(x_nchw, (2, 3, 0, 1)).astype(jnp.float32)

    # conv1 + BN1 + ReLU (kernel A); rows (h1, w1, b).
    p1, (h1, w1o) = _im2col_hwbc(x_hwbc)                           # (M1, 75)
    act1 = _conv1_call(p1.astype(jnp.bfloat16),
                       prep["w1_mat"], prep["shift1"])             # (M1, C1) bf16

    # act1 -> conv2 patches: plain reshape + strided slices, no transpose.
    act1_hwbc = act1.reshape(h1, w1o, batch, c1)
    p2, (h2, w2o) = _im2col_hwbc(act1_hwbc)                        # (H2*W2*B, 400) bf16
    h3, w3o = _conv_out(h2), _conv_out(w2o)

    # conv2 + conv3 + head fused (kernel B).
    return _tail_call(p2, prep["w2_mat"], prep["shift2"], prep["w3_r"],
                      prep["shift3"], prep["wh_r"], prep["bias_h"],
                      batch=batch, w2_out=w2o, h3_out=h3, w3_out=w3o)


# ----------------------------------------------------------------------------
# Pure-JAX reference (f32) for correctness checking.
# ----------------------------------------------------------------------------
def dqn_reference(x_nchw, params, eps=1e-5):
    def conv_bn_relu(x, layer):
        w, b, g, beta, mean, var = layer
        y = jax.lax.conv_general_dilated(
            x, w, window_strides=(STRIDE, STRIDE), padding="VALID",
            dimension_numbers=("NCHW", "OIHW", "NCHW"))
        y = y + b[None, :, None, None]
        y = (y - mean[None, :, None, None]) * (
            g[None, :, None, None] / jnp.sqrt(var[None, :, None, None] + eps)
        ) + beta[None, :, None, None]
        return jnp.maximum(y, 0.0)

    y = conv_bn_relu(x_nchw, params["conv1"])
    y = conv_bn_relu(y, params["conv2"])
    y = conv_bn_relu(y, params["conv3"])
    wh, bh = params["head"]
    return y.reshape(y.shape[0], -1) @ wh.T + bh


# ----------------------------------------------------------------------------
# Deterministic parameter initialization (shapes from DQN.__init__, torch layout).
# BN statistics are randomized so eval-mode BN folding is actually exercised.
# ----------------------------------------------------------------------------
def init_params(key, h, w, outputs):
    def conv2d_size_out(size, kernel_size=5, stride=2):
        return (size - (kernel_size - 1) - 1) // stride + 1

    convw = conv2d_size_out(conv2d_size_out(conv2d_size_out(w)))
    convh = conv2d_size_out(conv2d_size_out(conv2d_size_out(h)))
    linear_input_size = convw * convh * 32

    keys = iter(jax.random.split(key, 32))

    def conv_layer(cin, cout):
        weight = jax.random.normal(next(keys), (cout, cin, 5, 5), jnp.float32) * 0.05
        bias = jax.random.normal(next(keys), (cout,), jnp.float32) * 0.05
        gamma = 1.0 + 0.1 * jax.random.normal(next(keys), (cout,), jnp.float32)
        beta = 0.1 * jax.random.normal(next(keys), (cout,), jnp.float32)
        r_mean = 0.1 * jax.random.normal(next(keys), (cout,), jnp.float32)
        r_var = jax.random.uniform(next(keys), (cout,), jnp.float32, 0.5, 1.5)
        return (weight, bias, gamma, beta, r_mean, r_var)

    return {
        "conv1": conv_layer(3, 16),
        "conv2": conv_layer(16, 32),
        "conv3": conv_layer(32, 32),
        "head": (
            jax.random.normal(next(keys), (outputs, linear_input_size), jnp.float32) * 0.05,
            jax.random.normal(next(keys), (outputs,), jnp.float32) * 0.05,
        ),
    }


if __name__ == "__main__":
    # 3 input channels, spatial 32x32 (three stride-2 k=5 convs -> 14 -> 5 -> 1),
    # 4 actions, batch 2.
    batch, h, w, outputs = 2, 32, 32, 4

    key = jax.random.PRNGKey(0)
    k_params, k_x = jax.random.split(key)
    params = init_params(k_params, h, w, outputs)
    prep = prepare_params(params)                       # one-time weight re-layout
    x = jax.random.normal(k_x, (batch, 3, h, w), jnp.float32)   # NCHW like PyTorch

    fwd = jax.jit(dqn_forward)
    out = jax.block_until_ready(fwd(x, prep))
    assert out.shape == (batch, outputs), out.shape

    ref = dqn_reference(x, params)
    err = float(jnp.max(jnp.abs(out - ref)))
    assert err < 3e-2, f"max abs error vs f32 reference: {err}"
    print("KERNEL_OK")
</pallas_src>

<mosaic_0001>
module attributes {stable_mosaic.version = 11 : i64} {
  func.func @_conv1_kernel(%arg0: i32, %arg1: memref<392x75xbf16, #tpu.memory_space<vmem>>, %arg2: memref<75x16xbf16, #tpu.memory_space<vmem>>, %arg3: memref<1x16xf32, #tpu.memory_space<vmem>>, %arg4: memref<392x16xbf16, #tpu.memory_space<vmem>>) attributes {dimension_semantics = [#tpu.dimension_semantics<parallel>], iteration_bounds = array<i64: 1>, scalar_prefetch = 0 : i64, scratch_operands = 0 : i64, tpu.core_type = #tpu.core_type<tc>, window_params = [{transform_indices = @transform_0, window_bounds = array<i64: 392, 75>}, {pipeline_mode = #tpu.pipeline_mode<synchronous>, transform_indices = @transform_1, window_bounds = array<i64: 75, 16>}, {pipeline_mode = #tpu.pipeline_mode<synchronous>, transform_indices = @transform_2, window_bounds = array<i64: 1, 16>}, {transform_indices = @transform_3, window_bounds = array<i64: 392, 16>}]} {
    %c0 = arith.constant 0 : index
    %c0_0 = arith.constant 0 : index
    %0 = vector.load %arg1[%c0, %c0_0] : memref<392x75xbf16, #tpu.memory_space<vmem>>, vector<392x75xbf16>
    %c0_1 = arith.constant 0 : index
    %c0_2 = arith.constant 0 : index
    %1 = vector.load %arg2[%c0_1, %c0_2] : memref<75x16xbf16, #tpu.memory_space<vmem>>, vector<75x16xbf16>
    %cst = arith.constant dense<0.000000e+00> : vector<392x16xf32>
    %2 = tpu.matmul %0, %1, %cst {dimension_numbers = #tpu.dot_dimension_numbers<[1], [0], [0], [1], [0, 0, 1, 1], [], []>} : vector<392x75xbf16>, vector<75x16xbf16>, vector<392x16xf32> -> vector<392x16xf32>
    %c0_3 = arith.constant 0 : index
    %c0_4 = arith.constant 0 : index
    %3 = vector.load %arg3[%c0_3, %c0_4] : memref<1x16xf32, #tpu.memory_space<vmem>>, vector<1x16xf32>
    %4 = vector.broadcast %3 : vector<1x16xf32> to vector<392x16xf32>
    %5 = arith.addf %2, %4 : vector<392x16xf32>
    %cst_5 = arith.constant 0.000000e+00 : f32
    %6 = vector.broadcast %cst_5 : f32 to vector<392x16xf32>
    %7 = arith.maximumf %5, %6 : vector<392x16xf32>
    %8 = arith.truncf %7 : vector<392x16xf32> to vector<392x16xbf16>
    %c0_6 = arith.constant 0 : index
    %c0_7 = arith.constant 0 : index
    %9 = vector.load %arg4[%c0_6, %c0_7] : memref<392x16xbf16, #tpu.memory_space<vmem>>, vector<392x16xbf16>
    tpu.vector_store %arg4[%c0_6, %c0_7], %8 {strides = array<i32>} : memref<392x16xbf16, #tpu.memory_space<vmem>>, vector<392x16xbf16>,
    return
  }
  func.func @transform_0(%arg0: i32) -> (i32, i32) {
    %c0_i32 = arith.constant 0 : i32
    %c0_i32_0 = arith.constant 0 : i32
    return %arg0, %c0_i32 : i32, i32
  }
  func.func @transform_1(%arg0: i32) -> (i32, i32) {
    %c0_i32 = arith.constant 0 : i32
    %c0_i32_0 = arith.constant 0 : i32
    %c0_i32_1 = arith.constant 0 : i32
    return %c0_i32, %c0_i32_0 : i32, i32
  }
  func.func @transform_2(%arg0: i32) -> (i32, i32) {
    %c0_i32 = arith.constant 0 : i32
    %c0_i32_0 = arith.constant 0 : i32
    %c0_i32_1 = arith.constant 0 : i32
    return %c0_i32, %c0_i32_0 : i32, i32
  }
  func.func @transform_3(%arg0: i32) -> (i32, i32) {
    %c0_i32 = arith.constant 0 : i32
    %c0_i32_0 = arith.constant 0 : i32
    return %arg0, %c0_i32 : i32, i32
  }
}

module attributes {stable_mosaic.version = 11 : i64} {
  func.func @_tail_kernel(%arg0: memref<50x400xbf16, #tpu.memory_space<vmem>>, %arg1: memref<400x32xbf16, #tpu.memory_space<vmem>>, %arg2: memref<1x32xf32, #tpu.memory_space<vmem>>, %arg3: memref<25x32x32xbf16, #tpu.memory_space<vmem>>, %arg4: memref<1x32xf32, #tpu.memory_space<vmem>>, %arg5: memref<1x32x4xbf16, #tpu.memory_space<vmem>>, %arg6: memref<1x4xf32, #tpu.memory_space<vmem>>, %arg7: memref<2x4xf32, #tpu.memory_space<vmem>>) attributes {dimension_semantics = [], scalar_prefetch = 0 : i64, scratch_operands = 0 : i64, tpu.core_type = #tpu.core_type<tc>} {
    %c0 = arith.constant 0 : index
    %c0_0 = arith.constant 0 : index
    %0 = vector.load %arg0[%c0, %c0_0] : memref<50x400xbf16, #tpu.memory_space<vmem>>, vector<50x400xbf16>
    %c0_1 = arith.constant 0 : index
    %c0_2 = arith.constant 0 : index
    %1 = vector.load %arg1[%c0_1, %c0_2] : memref<400x32xbf16, #tpu.memory_space<vmem>>, vector<400x32xbf16>
    %cst = arith.constant dense<0.000000e+00> : vector<50x32xf32>
    %2 = tpu.matmul %0, %1, %cst {dimension_numbers = #tpu.dot_dimension_numbers<[1], [0], [0], [1], [0, 0, 1, 1], [], []>} : vector<50x400xbf16>, vector<400x32xbf16>, vector<50x32xf32> -> vector<50x32xf32>
    %c0_3 = arith.constant 0 : index
    %c0_4 = arith.constant 0 : index
    %3 = vector.load %arg2[%c0_3, %c0_4] : memref<1x32xf32, #tpu.memory_space<vmem>>, vector<1x32xf32>
    %4 = vector.broadcast %3 : vector<1x32xf32> to vector<50x32xf32>
    %5 = arith.addf %2, %4 : vector<50x32xf32>
    %cst_5 = arith.constant 0.000000e+00 : f32
    %6 = vector.broadcast %cst_5 : f32 to vector<50x32xf32>
    %7 = arith.maximumf %5, %6 : vector<50x32xf32>
    %8 = arith.truncf %7 : vector<50x32xf32> to vector<50x32xbf16>
    %cst_6 = arith.constant 0.000000e+00 : f32
    %9 = vector.broadcast %cst_6 : f32 to vector<2x4xf32>
    %cst_7 = arith.constant 0.000000e+00 : f32
    %10 = vector.broadcast %cst_7 : f32 to vector<2x32xf32>
    %11 = vector.extract_strided_slice %8 {offsets = [0, 0], sizes = [2, 32], strides = [1, 1]} : vector<50x32xbf16> to vector<2x32xbf16>
    %c0_8 = arith.constant 0 : index
    %c0_9 = arith.constant 0 : index
    %c0_10 = arith.constant 0 : index
    %12 = vector.load %arg3[%c0_8, %c0_9, %c0_10] : memref<25x32x32xbf16, #tpu.memory_space<vmem>>, vector<1x32x32xbf16>
    %13 = vector.shape_cast %12 : vector<1x32x32xbf16> to vector<32x32xbf16>
    %cst_11 = arith.constant dense<0.000000e+00> : vector<2x32xf32>
    %14 = tpu.matmul %11, %13, %cst_11 {dimension_numbers = #tpu.dot_dimension_numbers<[1], [0], [0], [1], [0, 0, 1, 1], [], []>} : vector<2x32xbf16>, vector<32x32xbf16>, vector<2x32xf32> -> vector<2x32xf32>
    %15 = arith.addf %10, %14 : vector<2x32xf32>
    %16 = vector.extract_strided_slice %8 {offsets = [2, 0], sizes = [2, 32], strides = [1, 1]} : vector<50x32xbf16> to vector<2x32xbf16>
    %c1 = arith.constant 1 : index
    %c0_12 = arith.constant 0 : index
    %c0_13 = arith.constant 0 : index
    %17 = vector.load %arg3[%c1, %c0_12, %c0_13] : memref<25x32x32xbf16, #tpu.memory_space<vmem>>, vector<1x32x32xbf16>
    %18 = vector.shape_cast %17 : vector<1x32x32xbf16> to vector<32x32xbf16>
    %cst_14 = arith.constant dense<0.000000e+00> : vector<2x32xf32>
    %19 = tpu.matmul %16, %18, %cst_14 {dimension_numbers = #tpu.dot_dimension_numbers<[1], [0], [0], [1], [0, 0, 1, 1], [], []>} : vector<2x32xbf16>, vector<32x32xbf16>, vector<2x32xf32> -> vector<2x32xf32>
    %20 = arith.addf %15, %19 : vector<2x32xf32>
    %21 = vector.extract_strided_slice %8 {offsets = [4, 0], sizes = [2, 32], strides = [1, 1]} : vector<50x32xbf16> to vector<2x32xbf16>
    %c2 = arith.constant 2 : index
    %c0_15 = arith.constant 0 : index
    %c0_16 = arith.constant 0 : index
    %22 = vector.load %arg3[%c2, %c0_15, %c0_16] : memref<25x32x32xbf16, #tpu.memory_space<vmem>>, vector<1x32x32xbf16>
    %23 = vector.shape_cast %22 : vector<1x32x32xbf16> to vector<32x32xbf16>
    %cst_17 = arith.constant dense<0.000000e+00> : vector<2x32xf32>
    %24 = tpu.matmul %21, %23, %cst_17 {dimension_numbers = #tpu.dot_dimension_numbers<[1], [0], [0], [1], [0, 0, 1, 1], [], []>} : vector<2x32xbf16>, vector<32x32xbf16>, vector<2x32xf32> -> vector<2x32xf32>
    %25 = arith.addf %20, %24 : vector<2x32xf32>
    %26 = vector.extract_strided_slice %8 {offsets = [6, 0], sizes = [2, 32], strides = [1, 1]} : vector<50x32xbf16> to vector<2x32xbf16>
    %c3 = arith.constant 3 : index
    %c0_18 = arith.constant 0 : index
    %c0_19 = arith.constant 0 : index
    %27 = vector.load %arg3[%c3, %c0_18, %c0_19] : memref<25x32x32xbf16, #tpu.memory_space<vmem>>, vector<1x32x32xbf16>
    %28 = vector.shape_cast %27 : vector<1x32x32xbf16> to vector<32x32xbf16>
    %cst_20 = arith.constant dense<0.000000e+00> : vector<2x32xf32>
    %29 = tpu.matmul %26, %28, %cst_20 {dimension_numbers = #tpu.dot_dimension_numbers<[1], [0], [0], [1], [0, 0, 1, 1], [], []>} : vector<2x32xbf16>, vector<32x32xbf16>, vector<2x32xf32> -> vector<2x32xf32>
    %30 = arith.addf %25, %29 : vector<2x32xf32>
    %31 = vector.extract_strided_slice %8 {offsets = [8, 0], sizes = [2, 32], strides = [1, 1]} : vector<50x32xbf16> to vector<2x32xbf16>
    %c4 = arith.constant 4 : index
    %c0_21 = arith.constant 0 : index
    %c0_22 = arith.constant 0 : index
    %32 = vector.load %arg3[%c4, %c0_21, %c0_22] : memref<25x32x32xbf16, #tpu.memory_space<vmem>>, vector<1x32x32xbf16>
    %33 = vector.shape_cast %32 : vector<1x32x32xbf16> to vector<32x32xbf16>
    %cst_23 = arith.constant dense<0.000000e+00> : vector<2x32xf32>
    %34 = tpu.matmul %31, %33, %cst_23 {dimension_numbers = #tpu.dot_dimension_numbers<[1], [0], [0], [1], [0, 0, 1, 1], [], []>} : vector<2x32xbf16>, vector<32x32xbf16>, vector<2x32xf32> -> vector<2x32xf32>
    %35 = arith.addf %30, %34 : vector<2x32xf32>
    %36 = vector.extract_strided_slice %8 {offsets = [10, 0], sizes = [2, 32], strides = [1, 1]} : vector<50x32xbf16> to vector<2x32xbf16>
    %c5 = arith.constant 5 : index
    %c0_24 = arith.constant 0 : index
    %c0_25 = arith.constant 0 : index
    %37 = vector.load %arg3[%c5, %c0_24, %c0_25] : memref<25x32x32xbf16, #tpu.memory_space<vmem>>, vector<1x32x32xbf16>
    %38 = vector.shape_cast %37 : vector<1x32x32xbf16> to vector<32x32xbf16>
    %cst_26 = arith.constant dense<0.000000e+00> : vector<2x32xf32>
    %39 = tpu.matmul %36, %38, %cst_26 {dimension_numbers = #tpu.dot_dimension_numbers<[1], [0], [0], [1], [0, 0, 1, 1], [], []>} : vector<2x32xbf16>, vector<32x32xbf16>, vector<2x32xf32> -> vector<2x32xf32>
    %40 = arith.addf %35, %39 : vector<2x32xf32>
    %41 = vector.extract_strided_slice %8 {offsets = [12, 0], sizes = [2, 32], strides = [1, 1]} : vector<50x32xbf16> to vector<2x32xbf16>
    %c6 = arith.constant 6 : index
    %c0_27 = arith.constant 0 : index
    %c0_28 = arith.constant 0 : index
    %42 = vector.load %arg3[%c6, %c0_27, %c0_28] : memref<25x32x32xbf16, #tpu.memory_space<vmem>>, vector<1x32x32xbf16>
    %43 = vector.shape_cast %42 : vector<1x32x32xbf16> to vector<32x32xbf16>
    %cst_29 = arith.constant dense<0.000000e+00> : vector<2x32xf32>
    %44 = tpu.matmul %41, %43, %cst_29 {dimension_numbers = #tpu.dot_dimension_numbers<[1], [0], [0], [1], [0, 0, 1, 1], [], []>} : vector<2x32xbf16>, vector<32x32xbf16>, vector<2x32xf32> -> vector<2x32xf32>
    %45 = arith.addf %40, %44 : vector<2x32xf32>
    %46 = vector.extract_strided_slice %8 {offsets = [14, 0], sizes = [2, 32], strides = [1, 1]} : vector<50x32xbf16> to vector<2x32xbf16>
    %c7 = arith.constant 7 : index
    %c0_30 = arith.constant 0 : index
    %c0_31 = arith.constant 0 : index
    %47 = vector.load %arg3[%c7, %c0_30, %c0_31] : memref<25x32x32xbf16, #tpu.memory_space<vmem>>, vector<1x32x32xbf16>
    %48 = vector.shape_cast %47 : vector<1x32x32xbf16> to vector<32x32xbf16>
    %cst_32 = arith.constant dense<0.000000e+00> : vector<2x32xf32>
    %49 = tpu.matmul %46, %48, %cst_32 {dimension_numbers = #tpu.dot_dimension_numbers<[1], [0], [0], [1], [0, 0, 1, 1], [], []>} : vector<2x32xbf16>, vector<32x32xbf16>, vector<2x32xf32> -> vector<2x32xf32>
    %50 = arith.addf %45, %49 : vector<2x32xf32>
    %51 = vector.extract_strided_slice %8 {offsets = [16, 0], sizes = [2, 32], strides = [1, 1]} : vector<50x32xbf16> to vector<2x32xbf16>
    %c8 = arith.constant 8 : index
    %c0_33 = arith.constant 0 : index
    %c0_34 = arith.constant 0 : index
    %52 = vector.load %arg3[%c8, %c0_33, %c0_34] : memref<25x32x32xbf16, #tpu.memory_space<vmem>>, vector<1x32x32xbf16>
    %53 = vector.shape_cast %52 : vector<1x32x32xbf16> to vector<32x32xbf16>
    %cst_35 = arith.constant dense<0.000000e+00> : vector<2x32xf32>
    %54 = tpu.matmul %51, %53, %cst_35 {dimension_numbers = #tpu.dot_dimension_numbers<[1], [0], [0], [1], [0, 0, 1, 1], [], []>} : vector<2x32xbf16>, vector<32x32xbf16>, vector<2x32xf32> -> vector<2x32xf32>
    %55 = arith.addf %50, %54 : vector<2x32xf32>
    %56 = vector.extract_strided_slice %8 {offsets = [18, 0], sizes = [2, 32], strides = [1, 1]} : vector<50x32xbf16> to vector<2x32xbf16>
    %c9 = arith.constant 9 : index
    %c0_36 = arith.constant 0 : index
    %c0_37 = arith.constant 0 : index
    %57 = vector.load %arg3[%c9, %c0_36, %c0_37] : memref<25x32x32xbf16, #tpu.memory_space<vmem>>, vector<1x32x32xbf16>
    %58 = vector.shape_cast %57 : vector<1x32x32xbf16> to vector<32x32xbf16>
    %cst_38 = arith.constant dense<0.000000e+00> : vector<2x32xf32>
    %59 = tpu.matmul %56, %58, %cst_38 {dimension_numbers = #tpu.dot_dimension_numbers<[1], [0], [0], [1], [0, 0, 1, 1], [], []>} : vector<2x32xbf16>, vector<32x32xbf16>, vector<2x32xf32> -> vector<2x32xf32>
    %60 = arith.addf %55, %59 : vector<2x32xf32>
    %61 = vector.extract_strided_slice %8 {offsets = [20, 0], sizes = [2, 32], strides = [1, 1]} : vector<50x32xbf16> to vector<2x32xbf16>
    %c10 = arith.constant 10 : index
    %c0_39 = arith.constant 0 : index
    %c0_40 = arith.constant 0 : index
    %62 = vector.load %arg3[%c10, %c0_39, %c0_40] : memref<25x32x32xbf16, #tpu.memory_space<vmem>>, vector<1x32x32xbf16>
    %63 = vector.shape_cast %62 : vector<1x32x32xbf16> to vector<32x32xbf16>
    %cst_41 = arith.constant dense<0.000000e+00> : vector<2x32xf32>
    %64 = tpu.matmul %61, %63, %cst_41 {dimension_numbers = #tpu.dot_dimension_numbers<[1], [0], [0], [1], [0, 0, 1, 1], [], []>} : vector<2x32xbf16>, vector<32x32xbf16>, vector<2x32xf32> -> vector<2x32xf32>
    %65 = arith.addf %60, %64 : vector<2x32xf32>
    %66 = vector.extract_strided_slice %8 {offsets = [22, 0], sizes = [2, 32], strides = [1, 1]} : vector<50x32xbf16> to vector<2x32xbf16>
    %c11 = arith.constant 11 : index
    %c0_42 = arith.constant 0 : index
    %c0_43 = arith.constant 0 : index
    %67 = vector.load %arg3[%c11, %c0_42, %c0_43] : memref<25x32x32xbf16, #tpu.memory_space<vmem>>, vector<1x32x32xbf16>
    %68 = vector.shape_cast %67 : vector<1x32x32xbf16> to vector<32x32xbf16>
    %cst_44 = arith.constant dense<0.000000e+00> : vector<2x32xf32>
    %69 = tpu.matmul %66, %68, %cst_44 {dimension_numbers = #tpu.dot_dimension_numbers<[1], [0], [0], [1], [0, 0, 1, 1], [], []>} : vector<2x32xbf16>, vector<32x32xbf16>, vector<2x32xf32> -> vector<2x32xf32>
    %70 = arith.addf %65, %69 : vector<2x32xf32>
    %71 = vector.extract_strided_slice %8 {offsets = [24, 0], sizes = [2, 32], strides = [1, 1]} : vector<50x32xbf16> to vector<2x32xbf16>
    %c12 = arith.constant 12 : index
    %c0_45 = arith.constant 0 : index
    %c0_46 = arith.constant 0 : index
    %72 = vector.load %arg3[%c12, %c0_45, %c0_46] : memref<25x32x32xbf16, #tpu.memory_space<vmem>>, vector<1x32x32xbf16>
    %73 = vector.shape_cast %72 : vector<1x32x32xbf16> to vector<32x32xbf16>
    %cst_47 = arith.constant dense<0.000000e+00> : vector<2x32xf32>
    %74 = tpu.matmul %71, %73, %cst_47 {dimension_numbers = #tpu.dot_dimension_numbers<[1], [0], [0], [1], [0, 0, 1, 1], [], []>} : vector<2x32xbf16>, vector<32x32xbf16>, vector<2x32xf32> -> vector<2x32xf32>
    %75 = arith.addf %70, %74 : vector<2x32xf32>
    %76 = vector.extract_strided_slice %8 {offsets = [26, 0], sizes = [2, 32], strides = [1, 1]} : vector<50x32xbf16> to vector<2x32xbf16>
    %c13 = arith.constant 13 : index
    %c0_48 = arith.constant 0 : index
    %c0_49 = arith.constant 0 : index
    %77 = vector.load %arg3[%c13, %c0_48, %c0_49] : memref<25x32x32xbf16, #tpu.memory_space<vmem>>, vector<1x32x32xbf16>
    %78 = vector.shape_cast %77 : vector<1x32x32xbf16> to vector<32x32xbf16>
    %cst_50 = arith.constant dense<0.000000e+00> : vector<2x32xf32>
    %79 = tpu.matmul %76, %78, %cst_50 {dimension_numbers = #tpu.dot_dimension_numbers<[1], [0], [0], [1], [0, 0, 1, 1], [], []>} : vector<2x32xbf16>, vector<32x32xbf16>, vector<2x32xf32> -> vector<2x32xf32>
    %80 = arith.addf %75, %79 : vector<2x32xf32>
    %81 = vector.extract_strided_slice %8 {offsets = [28, 0], sizes = [2, 32], strides = [1, 1]} : vector<50x32xbf16> to vector<2x32xbf16>
    %c14 = arith.constant 14 : index
    %c0_51 = arith.constant 0 : index
    %c0_52 = arith.constant 0 : index
    %82 = vector.load %arg3[%c14, %c0_51, %c0_52] : memref<25x32x32xbf16, #tpu.memory_space<vmem>>, vector<1x32x32xbf16>
    %83 = vector.shape_cast %82 : vector<1x32x32xbf16> to vector<32x32xbf16>
    %cst_53 = arith.constant dense<0.000000e+00> : vector<2x32xf32>
    %84 = tpu.matmul %81, %83, %cst_53 {dimension_numbers = #tpu.dot_dimension_numbers<[1], [0], [0], [1], [0, 0, 1, 1], [], []>} : vector<2x32xbf16>, vector<32x32xbf16>, vector<2x32xf32> -> vector<2x32xf32>
    %85 = arith.addf %80, %84 : vector<2x32xf32>
    %86 = vector.extract_strided_slice %8 {offsets = [30, 0], sizes = [2, 32], strides = [1, 1]} : vector<50x32xbf16> to vector<2x32xbf16>
    %c15 = arith.constant 15 : index
    %c0_54 = arith.constant 0 : index
    %c0_55 = arith.constant 0 : index
    %87 = vector.load %arg3[%c15, %c0_54, %c0_55] : memref<25x32x32xbf16, #tpu.memory_space<vmem>>, vector<1x32x32xbf16>
    %88 = vector.shape_cast %87 : vector<1x32x32xbf16> to vector<32x32xbf16>
    %cst_56 = arith.constant dense<0.000000e+00> : vector<2x32xf32>
    %89 = tpu.matmul %86, %88, %cst_56 {dimension_numbers = #tpu.dot_dimension_numbers<[1], [0], [0], [1], [0, 0, 1, 1], [], []>} : vector<2x32xbf16>, vector<32x32xbf16>, vector<2x32xf32> -> vector<2x32xf32>
    %90 = arith.addf %85, %89 : vector<2x32xf32>
    %91 = vector.extract_strided_slice %8 {offsets = [32, 0], sizes = [2, 32], strides = [1, 1]} : vector<50x32xbf16> to vector<2x32xbf16>
    %c16 = arith.constant 16 : index
    %c0_57 = arith.constant 0 : index
    %c0_58 = arith.constant 0 : index
    %92 = vector.load %arg3[%c16, %c0_57, %c0_58] : memref<25x32x32xbf16, #tpu.memory_space<vmem>>, vector<1x32x32xbf16>
    %93 = vector.shape_cast %92 : vector<1x32x32xbf16> to vector<32x32xbf16>
    %cst_59 = arith.constant dense<0.000000e+00> : vector<2x32xf32>
    %94 = tpu.matmul %91, %93, %cst_59 {dimension_numbers = #tpu.dot_dimension_numbers<[1], [0], [0], [1], [0, 0, 1, 1], [], []>} : vector<2x32xbf16>, vector<32x32xbf16>, vector<2x32xf32> -> vector<2x32xf32>
    %95 = arith.addf %90, %94 : vector<2x32xf32>
    %96 = vector.extract_strided_slice %8 {offsets = [34, 0], sizes = [2, 32], strides = [1, 1]} : vector<50x32xbf16> to vector<2x32xbf16>
    %c17 = arith.constant 17 : index
    %c0_60 = arith.constant 0 : index
    %c0_61 = arith.constant 0 : index
    %97 = vector.load %arg3[%c17, %c0_60, %c0_61] : memref<25x32x32xbf16, #tpu.memory_space<vmem>>, vector<1x32x32xbf16>
    %98 = vector.shape_cast %97 : vector<1x32x32xbf16> to vector<32x32xbf16>
    %cst_62 = arith.constant dense<0.000000e+00> : vector<2x32xf32>
    %99 = tpu.matmul %96, %98, %cst_62 {dimension_numbers = #tpu.dot_dimension_numbers<[1], [0], [0], [1], [0, 0, 1, 1], [], []>} : vector<2x32xbf16>, vector<32x32xbf16>, vector<2x32xf32> -> vector<2x32xf32>
    %100 = arith.addf %95, %99 : vector<2x32xf32>
    %101 = vector.extract_strided_slice %8 {offsets = [36, 0], sizes = [2, 32], strides = [1, 1]} : vector<50x32xbf16> to vector<2x32xbf16>
    %c18 = arith.constant 18 : index
    %c0_63 = arith.constant 0 : index
    %c0_64 = arith.constant 0 : index
    %102 = vector.load %arg3[%c18, %c0_63, %c0_64] : memref<25x32x32xbf16, #tpu.memory_space<vmem>>, vector<1x32x32xbf16>
    %103 = vector.shape_cast %102 : vector<1x32x32xbf16> to vector<32x32xbf16>
    %cst_65 = arith.constant dense<0.000000e+00> : vector<2x32xf32>
    %104 = tpu.matmul %101, %103, %cst_65 {dimension_numbers = #tpu.dot_dimension_numbers<[1], [0], [0], [1], [0, 0, 1, 1], [], []>} : vector<2x32xbf16>, vector<32x32xbf16>, vector<2x32xf32> -> vector<2x32xf32>
    %105 = arith.addf %100, %104 : vector<2x32xf32>
    %106 = vector.extract_strided_slice %8 {offsets = [38, 0], sizes = [2, 32], strides = [1, 1]} : vector<50x32xbf16> to vector<2x32xbf16>
    %c19 = arith.constant 19 : index
    %c0_66 = arith.constant 0 : index
    %c0_67 = arith.constant 0 : index
    %107 = vector.load %arg3[%c19, %c0_66, %c0_67] : memref<25x32x32xbf16, #tpu.memory_space<vmem>>, vector<1x32x32xbf16>
    %108 = vector.shape_cast %107 : vector<1x32x32xbf16> to vector<32x32xbf16>
    %cst_68 = arith.constant dense<0.000000e+00> : vector<2x32xf32>
    %109 = tpu.matmul %106, %108, %cst_68 {dimension_numbers = #tpu.dot_dimension_numbers<[1], [0], [0], [1], [0, 0, 1, 1], [], []>} : vector<2x32xbf16>, vector<32x32xbf16>, vector<2x32xf32> -> vector<2x32xf32>
    %110 = arith.addf %105, %109 : vector<2x32xf32>
    %111 = vector.extract_strided_slice %8 {offsets = [40, 0], sizes = [2, 32], strides = [1, 1]} : vector<50x32xbf16> to vector<2x32xbf16>
    %c20 = arith.constant 20 : index
    %c0_69 = arith.constant 0 : index
    %c0_70 = arith.constant 0 : index
    %112 = vector.load %arg3[%c20, %c0_69, %c0_70] : memref<25x32x32xbf16, #tpu.memory_space<vmem>>, vector<1x32x32xbf16>
    %113 = vector.shape_cast %112 : vector<1x32x32xbf16> to vector<32x32xbf16>
    %cst_71 = arith.constant dense<0.000000e+00> : vector<2x32xf32>
    %114 = tpu.matmul %111, %113, %cst_71 {dimension_numbers = #tpu.dot_dimension_numbers<[1], [0], [0], [1], [0, 0, 1, 1], [], []>} : vector<2x32xbf16>, vector<32x32xbf16>, vector<2x32xf32> -> vector<2x32xf32>
    %115 = arith.addf %110, %114 : vector<2x32xf32>
    %116 = vector.extract_strided_slice %8 {offsets = [42, 0], sizes = [2, 32], strides = [1, 1]} : vector<50x32xbf16> to vector<2x32xbf16>
    %c21 = arith.constant 21 : index
    %c0_72 = arith.constant 0 : index
    %c0_73 = arith.constant 0 : index
    %117 = vector.load %arg3[%c21, %c0_72, %c0_73] : memref<25x32x32xbf16, #tpu.memory_space<vmem>>, vector<1x32x32xbf16>
    %118 = vector.shape_cast %117 : vector<1x32x32xbf16> to vector<32x32xbf16>
    %cst_74 = arith.constant dense<0.000000e+00> : vector<2x32xf32>
    %119 = tpu.matmul %116, %118, %cst_74 {dimension_numbers = #tpu.dot_dimension_numbers<[1], [0], [0], [1], [0, 0, 1, 1], [], []>} : vector<2x32xbf16>, vector<32x32xbf16>, vector<2x32xf32> -> vector<2x32xf32>
    %120 = arith.addf %115, %119 : vector<2x32xf32>
    %121 = vector.extract_strided_slice %8 {offsets = [44, 0], sizes = [2, 32], strides = [1, 1]} : vector<50x32xbf16> to vector<2x32xbf16>
    %c22 = arith.constant 22 : index
    %c0_75 = arith.constant 0 : index
    %c0_76 = arith.constant 0 : index
    %122 = vector.load %arg3[%c22, %c0_75, %c0_76] : memref<25x32x32xbf16, #tpu.memory_space<vmem>>, vector<1x32x32xbf16>
    %123 = vector.shape_cast %122 : vector<1x32x32xbf16> to vector<32x32xbf16>
    %cst_77 = arith.constant dense<0.000000e+00> : vector<2x32xf32>
    %124 = tpu.matmul %121, %123, %cst_77 {dimension_numbers = #tpu.dot_dimension_numbers<[1], [0], [0], [1], [0, 0, 1, 1], [], []>} : vector<2x32xbf16>, vector<32x32xbf16>, vector<2x32xf32> -> vector<2x32xf32>
    %125 = arith.addf %120, %124 : vector<2x32xf32>
    %126 = vector.extract_strided_slice %8 {offsets = [46, 0], sizes = [2, 32], strides = [1, 1]} : vector<50x32xbf16> to vector<2x32xbf16>
    %c23 = arith.constant 23 : index
    %c0_78 = arith.constant 0 : index
    %c0_79 = arith.constant 0 : index
    %127 = vector.load %arg3[%c23, %c0_78, %c0_79] : memref<25x32x32xbf16, #tpu.memory_space<vmem>>, vector<1x32x32xbf16>
    %128 = vector.shape_cast %127 : vector<1x32x32xbf16> to vector<32x32xbf16>
    %cst_80 = arith.constant dense<0.000000e+00> : vector<2x32xf32>
    %129 = tpu.matmul %126, %128, %cst_80 {dimension_numbers = #tpu.dot_dimension_numbers<[1], [0], [0], [1], [0, 0, 1, 1], [], []>} : vector<2x32xbf16>, vector<32x32xbf16>, vector<2x32xf32> -> vector<2x32xf32>
    %130 = arith.addf %125, %129 : vector<2x32xf32>
    %131 = vector.extract_strided_slice %8 {offsets = [48, 0], sizes = [2, 32], strides = [1, 1]} : vector<50x32xbf16> to vector<2x32xbf16>
    %c24 = arith.constant 24 : index
    %c0_81 = arith.constant 0 : index
    %c0_82 = arith.constant 0 : index
    %132 = vector.load %arg3[%c24, %c0_81, %c0_82] : memref<25x32x32xbf16, #tpu.memory_space<vmem>>, vector<1x32x32xbf16>
    %133 = vector.shape_cast %132 : vector<1x32x32xbf16> to vector<32x32xbf16>
    %cst_83 = arith.constant dense<0.000000e+00> : vector<2x32xf32>
    %134 = tpu.matmul %131, %133, %cst_83 {dimension_numbers = #tpu.dot_dimension_numbers<[1], [0], [0], [1], [0, 0, 1, 1], [], []>} : vector<2x32xbf16>, vector<32x32xbf16>, vector<2x32xf32> -> vector<2x32xf32>
    %135 = arith.addf %130, %134 : vector<2x32xf32>
    %c0_84 = arith.constant 0 : index
    %c0_85 = arith.constant 0 : index
    %136 = vector.load %arg4[%c0_84, %c0_85] : memref<1x32xf32, #tpu.memory_space<vmem>>, vector<1x32xf32>
    %137 = vector.broadcast %136 : vector<1x32xf32> to vector<2x32xf32>
    %138 = arith.addf %135, %137 : vector<2x32xf32>
    %cst_86 = arith.constant 0.000000e+00 : f32
    %139 = vector.broadcast %cst_86 : f32 to vector<2x32xf32>
    %140 = arith.maximumf %138, %139 : vector<2x32xf32>
    %141 = arith.truncf %140 : vector<2x32xf32> to vector<2x32xbf16>
    %c0_87 = arith.constant 0 : index
    %c0_88 = arith.constant 0 : index
    %c0_89 = arith.constant 0 : index
    %142 = vector.load %arg5[%c0_87, %c0_88, %c0_89] : memref<1x32x4xbf16, #tpu.memory_space<vmem>>, vector<1x32x4xbf16>
    %143 = vector.shape_cast %142 : vector<1x32x4xbf16> to vector<32x4xbf16>
    %cst_90 = arith.constant dense<0.000000e+00> : vector<2x4xf32>
    %144 = tpu.matmul %141, %143, %cst_90 {dimension_numbers = #tpu.dot_dimension_numbers<[1], [0], [0], [1], [0, 0, 1, 1], [], []>} : vector<2x32xbf16>, vector<32x4xbf16>, vector<2x4xf32> -> vector<2x4xf32>
    %145 = arith.addf %9, %144 : vector<2x4xf32>
    %c0_91 = arith.constant 0 : index
    %c0_92 = arith.constant 0 : index
    %146 = vector.load %arg6[%c0_91, %c0_92] : memref<1x4xf32, #tpu.memory_space<vmem>>, vector<1x4xf32>
    %147 = vector.broadcast %146 : vector<1x4xf32> to vector<2x4xf32>
    %148 = arith.addf %145, %147 : vector<2x4xf32>
    %c0_93 = arith.constant 0 : index
    %c0_94 = arith.constant 0 : index
    %149 = vector.load %arg7[%c0_93, %c0_94] : memref<2x4xf32, #tpu.memory_space<vmem>>, vector<2x4xf32>
    tpu.vector_store %arg7[%c0_93, %c0_94], %148 {strides = array<i32>} : memref<2x4xf32, #tpu.memory_space<vmem>>, vector<2x4xf32>,
    return
  }
}

</mosaic_0001>

<bundles_post_ra>
// kernel: dqn_forward.2
= control target key start
LH: loop header
LB: loop body
LE: loop exit
PB: predicated region body
PF: predicated region fallthrough
CT: control target
= control target key end

     0   :  { %v1185_v0 = vmov 0.0   ;;  %vm1186_vm0 = vmmov 0   ;;  %vm309_vm1 = vcmask 1044480   ;;  %vm310_vm2 = vcmask 1045504   ;;  %s1633_s1 = inlined_call_operand.vmem [shape: bf16[75,16], index: 1, kind: input, shape index: {}]   ;;  %s1634_s0 = inlined_call_operand.vmem [shape: bf16[392,75], index: 0, kind: input, shape index: {}]   ;;  %s1635_s2 = inlined_call_operand.vmem [shape: f32[1,16], index: 2, kind: input, shape index: {}]   ;;  %s1636_s3 = inlined_call_operand.vmem [shape: bf16[392,16], index: 3, kind: output, shape index: {}]  }
   0x1   :  { %1032 = vmatprep.subr.bf16.mxu0 %v1185_v0  ;;  %v1155_v1 = vld [vmem:[%s1633_s1] sm:$0xff]   ;;  %1142 = vmatprep.subr.bf16.mxu1 %v1185_v0  ;;  %v1156_v2 = vld [vmem:[%s1633_s1 + $0x8] sm:$0xff]   ;;  %v1157_v3 = vld [vmem:[%s1633_s1 + $0x10] sm:$0xff]   ;;  %v1187_v4 = vmov 65535   ;;  %vm233_vm3 = vcmask 613376   ;;  %vm794_vm4 = vcmask 125952  }
   0x2   :  { %1033 = vmatpush3.bf16.msra.mxu0 %v1155_v1  ;;  %1147 = vmatpush3.bf16.msra.mxu1 %v1155_v1  ;;  %v311_v5 = vsel %vm309_vm1, 4294967295, %v1187_v4  ;;  %v1158_v6 = vld [vmem:[%s1633_s1 + $0x18] sm:$0xff]   ;;  %v1159_v7 = vld [vmem:[%s1633_s1 + $0x20] sm:$0x3f]   ;;  %v1161_v11 = vld [vmem:[%s1634_s0 + $0x68] sm:$0xff]  }
   0x3   :  { %1034 = vmatprep.subr.bf16.mxu0 %v1185_v0  ;;  %1143 = vmatprep.subr.bf16.mxu1 %v1185_v0  ;;  %v312_v8 = vsel %vm310_vm2, %v311_v5, 0  ;;  %v1160_v10 = vld [vmem:[%s1634_s0] sm:$0xff]   ;;  %v1162_v12 = vld [vmem:[%s1634_s0 + $0x8] sm:$0xff]   ;;  %v1163_v13 = vld [vmem:[%s1634_s0 + $0x70] sm:$0xff]  }
   0x4   :  { %1042 = vmatprep.mubr.msk.bf16.mxu0 %vm1186_vm0, %v1185_v0  ;;  %1094 = vmatprep.mubr.msk.bf16.mxu1 %vm1186_vm0, %v1185_v0  ;;  %v314_v9 = vand.u32 %v1159_v7, %v312_v8  ;;  %v1164_v14 = vld [vmem:[%s1634_s0 + $0x10] sm:$0xff]   ;;  %v1165_v15 = vld [vmem:[%s1634_s0 + $0x78] sm:$0xff]   ;;  %v1167_v17 = vld [vmem:[%s1634_s0 + $0x80] sm:$0xff]  }
   0x5   :  { %v1166_v16 = vld [vmem:[%s1634_s0 + $0x18] sm:$0xff]   ;;  %v1168_v18 = vld [vmem:[%s1634_s0 + $0x20] sm:$0xff]   ;;  %v1169_v19 = vld [vmem:[%s1634_s0 + $0x88] sm:$0xff]  }
   0x6   :  { %1035 = vmatpush3.bf16.msra.mxu0 %v1156_v2  ;;  %1148 = vmatpush3.bf16.msra.mxu1 %v1156_v2  ;;  %v1170_v20 = vld [vmem:[%s1634_s0 + $0x28] sm:$0xff]   ;;  %v1171_v21 = vld [vmem:[%s1634_s0 + $0x90] sm:$0xff]   ;;  %v1173_v23 = vld [vmem:[%s1634_s0 + $0x98] sm:$0xff]  }
   0x7   :  { %1036 = vmatprep.subr.bf16.mxu0 %v1185_v0  ;;  %1144 = vmatprep.subr.bf16.mxu1 %v1185_v0  ;;  %v1172_v22 = vld [vmem:[%s1634_s0 + $0x30] sm:$0xff]   ;;  %v1174_v24 = vld [vmem:[%s1634_s0 + $0x38] sm:$0xff]   ;;  %v1175_v25 = vld [vmem:[%s1634_s0 + $0xa0] sm:$0xff]  }
   0x8   :  { %v1176_v26 = vld [vmem:[%s1634_s0 + $0x40] sm:$0xff]   ;;  %v1177_v27 = vld [vmem:[%s1634_s0 + $0xa8] sm:$0xff]   ;;  %v1179_v29 = vld [vmem:[%s1634_s0 + $0xb0] sm:$0xff]  }
   0x9   :  { %v1178_v28 = vld [vmem:[%s1634_s0 + $0x48] sm:$0xff]   ;;  %v1180_v30 = vld [vmem:[%s1634_s0 + $0x50] sm:$0xff]   ;;  %v1181_v31 = vld [vmem:[%s1634_s0 + $0xb8] sm:$0xff]  }
   0xa   :  { %1037 = vmatpush3.bf16.msra.mxu0 %v1157_v3  ;;  %1149 = vmatpush3.bf16.msra.mxu1 %v1157_v3  ;;  %v1182_v32 = vld [vmem:[%s1634_s0 + $0x58] sm:$0xff]   ;;  %v1183_v33 = vld [vmem:[%s1634_s0 + $0xc0] ss:$0 sps:$4 sm:$0xff]  }
   0xb   :  { %1038 = vmatprep.subr.bf16.mxu0 %v1185_v0  ;;  %1145 = vmatprep.subr.bf16.mxu1 %v1185_v0  ;;  %v1184_v34 = vld [vmem:[%s1634_s0 + $0x60] sm:$0xff]  }
   0xc   :  { %v1386_v35 = vld [vmem:[%s1635_s2] ss:$0 sm:$0xff] }
   0xe   :  { %1039 = vmatpush3.bf16.msra.mxu0 %v1158_v6  ;;  %1150 = vmatpush3.bf16.msra.mxu1 %v1158_v6 }
   0xf   :  { %1040 = vmatprep.subr.bf16.mxu0 %v1185_v0  ;;  %1146 = vmatprep.subr.bf16.mxu1 %v1185_v0 }
  0x12   :  { %1041 = vmatpush3.bf16.msra.mxu0 %v314_v9  ;;  %1151 = vmatpush3.bf16.msra.mxu1 %v314_v9 }
  0x15   :  { %1043 = vmatmul.mubr.msk.bf16.vlgmr.msra.gmra.mrb[0].mxu0 %vm233_vm3, %v1160_v10  ;;  %1095 = vmatmul.mubr.msk.bf16.vlgmr.msra.gmra.mrb[0].mxu1 %vm233_vm3, %v1161_v11 }
  0x16   :  { %1046 = vmatprep.mubr.msk.bf16.mxu0 %vm1186_vm0, %v1185_v0  ;;  %1098 = vmatprep.mubr.msk.bf16.mxu1 %vm1186_vm0, %v1185_v0 }
  0x1d   :  { %1047 = vmatmul.mubr.msk.bf16.gmra.mrb[4].mxu0 %vm233_vm3, %v1162_v12  ;;  %1099 = vmatmul.mubr.msk.bf16.gmra.mrb[4].mxu1 %vm233_vm3, %v1163_v13 }
  0x1e   :  { %1050 = vmatprep.mubr.msk.bf16.mxu0 %vm1186_vm0, %v1185_v0  ;;  %1102 = vmatprep.mubr.msk.bf16.mxu1 %vm1186_vm0, %v1185_v0 }
  0x25   :  { %1051 = vmatmul.mubr.msk.bf16.gmra.mrb[8].mxu0 %vm233_vm3, %v1164_v14  ;;  %1103 = vmatmul.mubr.msk.bf16.gmra.mrb[8].mxu1 %vm233_vm3, %v1165_v15 }
  0x26   :  { %1054 = vmatprep.mubr.msk.bf16.mxu0 %vm1186_vm0, %v1185_v0  ;;  %1106 = vmatprep.mubr.msk.bf16.mxu1 %vm1186_vm0, %v1185_v0 }
  0x2d   :  { %1055 = vmatmul.mubr.msk.bf16.gmra.mrb[12].mxu0 %vm233_vm3, %v1166_v16  ;;  %1107 = vmatmul.mubr.msk.bf16.gmra.mrb[12].mxu1 %vm233_vm3, %v1167_v17 }
  0x2e   :  { %1058 = vmatprep.mubr.msk.bf16.mxu0 %vm1186_vm0, %v1185_v0  ;;  %1110 = vmatprep.mubr.msk.bf16.mxu1 %vm1186_vm0, %v1185_v0 }
  0x35   :  { %1059 = vmatmul.mubr.msk.bf16.gmra.mrb[16].mxu0 %vm233_vm3, %v1168_v18  ;;  %1111 = vmatmul.mubr.msk.bf16.gmra.mrb[16].mxu1 %vm233_vm3, %v1169_v19 }
  0x36   :  { %1062 = vmatprep.mubr.msk.bf16.mxu0 %vm1186_vm0, %v1185_v0  ;;  %1114 = vmatprep.mubr.msk.bf16.mxu1 %vm1186_vm0, %v1185_v0 }
  0x3d   :  { %1063 = vmatmul.mubr.msk.bf16.gmra.mrb[20].mxu0 %vm233_vm3, %v1170_v20  ;;  %1115 = vmatmul.mubr.msk.bf16.gmra.mrb[20].mxu1 %vm233_vm3, %v1171_v21 }
  0x3e   :  { %1066 = vmatprep.mubr.msk.bf16.mxu0 %vm1186_vm0, %v1185_v0  ;;  %1118 = vmatprep.mubr.msk.bf16.mxu1 %vm1186_vm0, %v1185_v0 }
  0x45   :  { %1067 = vmatmul.mubr.msk.bf16.gmra.mrb[24].mxu0 %vm233_vm3, %v1172_v22  ;;  %1119 = vmatmul.mubr.msk.bf16.gmra.mrb[24].mxu1 %vm233_vm3, %v1173_v23 }
  0x46   :  { %1070 = vmatprep.mubr.msk.bf16.mxu0 %vm1186_vm0, %v1185_v0  ;;  %1122 = vmatprep.mubr.msk.bf16.mxu1 %vm1186_vm0, %v1185_v0 }
  0x4d   :  { %1071 = vmatmul.mubr.msk.bf16.gmra.mrb[28].mxu0 %vm233_vm3, %v1174_v24  ;;  %1123 = vmatmul.mubr.msk.bf16.gmra.mrb[28].mxu1 %vm233_vm3, %v1175_v25 }
  0x4e   :  { %1074 = vmatprep.mubr.msk.bf16.mxu0 %vm1186_vm0, %v1185_v0  ;;  %1126 = vmatprep.mubr.msk.bf16.mxu1 %vm1186_vm0, %v1185_v0 }
  0x55   :  { %1075 = vmatmul.mubr.msk.bf16.gmra.mrb[32].mxu0 %vm233_vm3, %v1176_v26  ;;  %1127 = vmatmul.mubr.msk.bf16.gmra.mrb[32].mxu1 %vm233_vm3, %v1177_v27 }
  0x56   :  { %1078 = vmatprep.mubr.msk.bf16.mxu0 %vm1186_vm0, %v1185_v0  ;;  %1130 = vmatprep.mubr.msk.bf16.mxu1 %vm1186_vm0, %v1185_v0 }
  0x5d   :  { %1079 = vmatmul.mubr.msk.bf16.gmra.mrb[36].mxu0 %vm233_vm3, %v1178_v28  ;;  %1131 = vmatmul.mubr.msk.bf16.gmra.mrb[36].mxu1 %vm233_vm3, %v1179_v29 }
  0x5e   :  { %1082 = vmatprep.mubr.msk.bf16.mxu0 %vm1186_vm0, %v1185_v0  ;;  %1134 = vmatprep.mubr.msk.bf16.mxu1 %vm1186_vm0, %v1185_v0 }
  0x65   :  { %1083 = vmatmul.mubr.msk.bf16.gmra.mrb[40].mxu0 %vm233_vm3, %v1180_v30  ;;  %1135 = vmatmul.mubr.msk.bf16.gmra.mrb[40].mxu1 %vm233_vm3, %v1181_v31 }
  0x66   :  { %1086 = vmatprep.mubr.msk.bf16.mxu0 %vm1186_vm0, %v1185_v0  ;;  %1138 = vmatprep.mubr.msk.bf16.mxu1 %vm1186_vm0, %v1185_v0 }
  0x6d   :  { %1087 = vmatmul.mubr.msk.bf16.gmra.mrb[44].mxu0 %vm233_vm3, %v1182_v32  ;;  %1139 = vmatmul.mubr.msk.bf16.gmra.mrb[44].mxu1 %vm233_vm3, %v1183_v33 }
  0x6e   :  { %1090 = vmatprep.mubr.msk.bf16.mxu0 %vm1186_vm0, %v1185_v0 }
  0x75   :  { %1091 = vmatmul.mubr.msk.bf16.gmra.mrb[48].mxu0 %vm233_vm3, %v1184_v34 }
  0xe8   :  { %v350_v36 = vpop.f32.mrb[0].mxu0  ;;  %v454_v37 = vpop.f32.mrb[0].mxu1 }
  0xe9   :  { %v351_v38 = vadd.f32 %v1386_v35, %v350_v36  ;;  %v1044_v39 = vpop.f32.mrb[1].mxu0  ;;  %v455_v40 = vadd.f32 %v1386_v35, %v454_v37  ;;  %v1096_v41 = vpop.f32.mrb[1].mxu1 }
  0xea   :  { %v353_v42 = vpop.f32.mrb[2].mxu0  ;;  %v457_v43 = vpop.f32.mrb[2].mxu1 }
  0xeb   :  { %v548_v44 = vmax.f32 %v351_v38, 0.0  ;;  %v354_v45 = vadd.f32 %v1386_v35, %v353_v42  ;;  %v1045_v46 = vpop.f32.mrb[3].mxu0  ;;  %v574_v47 = vmax.f32 %v455_v40, 0.0  ;;  %v458_v48 = vadd.f32 %v1386_v35, %v457_v43  ;;  %v1097_v49 = vpop.f32.mrb[3].mxu1 }
  0xed   :  { %v953_v50 = vpack.c.bf16 %v548_v44, %v548_v44  ;;  %v549_v51 = vmax.f32 %v354_v45, 0.0  ;;  %v979_v52 = vpack.c.bf16 %v574_v47, %v574_v47  ;;  %v575_v53 = vmax.f32 %v458_v48, 0.0 }
  0xef   :  { %795 = vst.msk [vmem:[%s1636_s3] sm:$0xf] %vm794_vm4, %v953_v50  ;;  %v954_v54 = vpack.c.bf16 %v549_v51, %v549_v51  ;;  %821 = vst.msk [vmem:[%s1636_s3 + $0x68] sm:$0xf] %vm794_vm4, %v979_v52  ;;  %v980_v55 = vpack.c.bf16 %v575_v53, %v575_v53 }
  0xf0   :  { %v358_v56 = vpop.f32.mrb[4].mxu0  ;;  %v462_v57 = vpop.f32.mrb[4].mxu1 }
  0xf1   :  { %796 = vst.msk [vmem:[%s1636_s3 + $0x4] sm:$0xf] %vm794_vm4, %v954_v54  ;;  %v359_v58 = vadd.f32 %v1386_v35, %v358_v56  ;;  %v1048_v59 = vpop.f32.mrb[5].mxu0  ;;  %822 = vst.msk [vmem:[%s1636_s3 + $0x6c] sm:$0xf] %vm794_vm4, %v980_v55  ;;  %v463_v60 = vadd.f32 %v1386_v35, %v462_v57  ;;  %v1100_v61 = vpop.f32.mrb[5].mxu1 }
  0xf2   :  { %v361_v62 = vpop.f32.mrb[6].mxu0  ;;  %v465_v63 = vpop.f32.mrb[6].mxu1 }
  0xf3   :  { %v550_v0 = vmax.f32 %v359_v58, 0.0  ;;  %v362_v1 = vadd.f32 %v1386_v35, %v361_v62  ;;  %v1049_v2 = vpop.f32.mrb[7].mxu0  ;;  %v576_v3 = vmax.f32 %v463_v60, 0.0  ;;  %v466_v4 = vadd.f32 %v1386_v35, %v465_v63  ;;  %v1101_v5 = vpop.f32.mrb[7].mxu1 }
  0xf5   :  { %v955_v6 = vpack.c.bf16 %v550_v0, %v550_v0  ;;  %v551_v7 = vmax.f32 %v362_v1, 0.0  ;;  %v981_v8 = vpack.c.bf16 %v576_v3, %v576_v3  ;;  %v577_v9 = vmax.f32 %v466_v4, 0.0 }
  0xf7   :  { %797 = vst.msk [vmem:[%s1636_s3 + $0x8] sm:$0xf] %vm794_vm4, %v955_v6  ;;  %v956_v10 = vpack.c.bf16 %v551_v7, %v551_v7  ;;  %823 = vst.msk [vmem:[%s1636_s3 + $0x70] sm:$0xf] %vm794_vm4, %v981_v8  ;;  %v982_v11 = vpack.c.bf16 %v577_v9, %v577_v9 }
  0xf8   :  { %v366_v12 = vpop.f32.mrb[8].mxu0  ;;  %v470_v13 = vpop.f32.mrb[8].mxu1 }
  0xf9   :  { %798 = vst.msk [vmem:[%s1636_s3 + $0xc] sm:$0xf] %vm794_vm4, %v956_v10  ;;  %v367_v14 = vadd.f32 %v1386_v35, %v366_v12  ;;  %v1052_v15 = vpop.f32.mrb[9].mxu0  ;;  %824 = vst.msk [vmem:[%s1636_s3 + $0x74] sm:$0xf] %vm794_vm4, %v982_v11  ;;  %v471_v16 = vadd.f32 %v1386_v35, %v470_v13  ;;  %v1104_v17 = vpop.f32.mrb[9].mxu1 }
  0xfa   :  { %v369_v18 = vpop.f32.mrb[10].mxu0  ;;  %v473_v19 = vpop.f32.mrb[10].mxu1 }
  0xfb   :  { %v552_v20 = vmax.f32 %v367_v14, 0.0  ;;  %v370_v21 = vadd.f32 %v1386_v35, %v369_v18  ;;  %v1053_v22 = vpop.f32.mrb[11].mxu0  ;;  %v578_v23 = vmax.f32 %v471_v16, 0.0  ;;  %v474_v24 = vadd.f32 %v1386_v35, %v473_v19  ;;  %v1105_v25 = vpop.f32.mrb[11].mxu1 }
  0xfd   :  { %v957_v26 = vpack.c.bf16 %v552_v20, %v552_v20  ;;  %v553_v27 = vmax.f32 %v370_v21, 0.0  ;;  %v983_v28 = vpack.c.bf16 %v578_v23, %v578_v23  ;;  %v579_v29 = vmax.f32 %v474_v24, 0.0 }
  0xff   :  { %799 = vst.msk [vmem:[%s1636_s3 + $0x10] sm:$0xf] %vm794_vm4, %v957_v26  ;;  %v958_v30 = vpack.c.bf16 %v553_v27, %v553_v27  ;;  %825 = vst.msk [vmem:[%s1636_s3 + $0x78] sm:$0xf] %vm794_vm4, %v983_v28  ;;  %v984_v31 = vpack.c.bf16 %v579_v29, %v579_v29 }
 0x100   :  { %v374_v32 = vpop.f32.mrb[12].mxu0  ;;  %v478_v33 = vpop.f32.mrb[12].mxu1 }
 0x101   :  { %800 = vst.msk [vmem:[%s1636_s3 + $0x14] sm:$0xf] %vm794_vm4, %v958_v30  ;;  %v375_v34 = vadd.f32 %v1386_v35, %v374_v32  ;;  %v1056_v36 = vpop.f32.mrb[13].mxu0  ;;  %826 = vst.msk [vmem:[%s1636_s3 + $0x7c] sm:$0xf] %vm794_vm4, %v984_v31  ;;  %v479_v37 = vadd.f32 %v1386_v35, %v478_v33  ;;  %v1108_v38 = vpop.f32.mrb[13].mxu1 }
 0x102   :  { %v377_v39 = vpop.f32.mrb[14].mxu0  ;;  %v481_v40 = vpop.f32.mrb[14].mxu1 }
 0x103   :  { %v554_v41 = vmax.f32 %v375_v34, 0.0  ;;  %v378_v42 = vadd.f32 %v1386_v35, %v377_v39  ;;  %v1057_v43 = vpop.f32.mrb[15].mxu0  ;;  %v580_v44 = vmax.f32 %v479_v37, 0.0  ;;  %v482_v45 = vadd.f32 %v1386_v35, %v481_v40  ;;  %v1109_v46 = vpop.f32.mrb[15].mxu1 }
 0x105   :  { %v959_v47 = vpack.c.bf16 %v554_v41, %v554_v41  ;;  %v555_v48 = vmax.f32 %v378_v42, 0.0  ;;  %v985_v49 = vpack.c.bf16 %v580_v44, %v580_v44  ;;  %v581_v50 = vmax.f32 %v482_v45, 0.0 }
 0x107   :  { %801 = vst.msk [vmem:[%s1636_s3 + $0x18] sm:$0xf] %vm794_vm4, %v959_v47  ;;  %v960_v51 = vpack.c.bf16 %v555_v48, %v555_v48  ;;  %827 = vst.msk [vmem:[%s1636_s3 + $0x80] sm:$0xf] %vm794_vm4, %v985_v49  ;;  %v986_v52 = vpack.c.bf16 %v581_v50, %v581_v50 }
 0x108   :  { %v382_v53 = vpop.f32.mrb[16].mxu0  ;;  %v486_v54 = vpop.f32.mrb[16].mxu1 }
 0x109   :  { %802 = vst.msk [vmem:[%s1636_s3 + $0x1c] sm:$0xf] %vm794_vm4, %v960_v51  ;;  %v383_v55 = vadd.f32 %v1386_v35, %v382_v53  ;;  %v1060_v56 = vpop.f32.mrb[17].mxu0  ;;  %828 = vst.msk [vmem:[%s1636_s3 + $0x84] sm:$0xf] %vm794_vm4, %v986_v52  ;;  %v487_v57 = vadd.f32 %v1386_v35, %v486_v54  ;;  %v1112_v58 = vpop.f32.mrb[17].mxu1 }
 0x10a   :  { %v385_v59 = vpop.f32.mrb[18].mxu0  ;;  %v489_v60 = vpop.f32.mrb[18].mxu1 }
 0x10b   :  { %v556_v61 = vmax.f32 %v383_v55, 0.0  ;;  %v386_v62 = vadd.f32 %v1386_v35, %v385_v59  ;;  %v1061_v63 = vpop.f32.mrb[19].mxu0  ;;  %v582_v0 = vmax.f32 %v487_v57, 0.0  ;;  %v490_v1 = vadd.f32 %v1386_v35, %v489_v60  ;;  %v1113_v2 = vpop.f32.mrb[19].mxu1 }
 0x10d   :  { %v961_v3 = vpack.c.bf16 %v556_v61, %v556_v61  ;;  %v557_v4 = vmax.f32 %v386_v62, 0.0  ;;  %v987_v5 = vpack.c.bf16 %v582_v0, %v582_v0  ;;  %v583_v6 = vmax.f32 %v490_v1, 0.0 }
 0x10f   :  { %803 = vst.msk [vmem:[%s1636_s3 + $0x20] sm:$0xf] %vm794_vm4, %v961_v3  ;;  %v962_v7 = vpack.c.bf16 %v557_v4, %v557_v4  ;;  %829 = vst.msk [vmem:[%s1636_s3 + $0x88] sm:$0xf] %vm794_vm4, %v987_v5  ;;  %v988_v8 = vpack.c.bf16 %v583_v6, %v583_v6 }
 0x110   :  { %v390_v9 = vpop.f32.mrb[20].mxu0  ;;  %v494_v10 = vpop.f32.mrb[20].mxu1 }
 0x111   :  { %804 = vst.msk [vmem:[%s1636_s3 + $0x24] sm:$0xf] %vm794_vm4, %v962_v7  ;;  %v391_v11 = vadd.f32 %v1386_v35, %v390_v9  ;;  %v1064_v12 = vpop.f32.mrb[21].mxu0  ;;  %830 = vst.msk [vmem:[%s1636_s3 + $0x8c] sm:$0xf] %vm794_vm4, %v988_v8  ;;  %v495_v13 = vadd.f32 %v1386_v35, %v494_v10  ;;  %v1116_v14 = vpop.f32.mrb[21].mxu1 }
 0x112   :  { %v393_v15 = vpop.f32.mrb[22].mxu0  ;;  %v497_v16 = vpop.f32.mrb[22].mxu1 }
 0x113   :  { %v558_v17 = vmax.f32 %v391_v11, 0.0  ;;  %v394_v18 = vadd.f32 %v1386_v35, %v393_v15  ;;  %v1065_v19 = vpop.f32.mrb[23].mxu0  ;;  %v584_v20 = vmax.f32 %v495_v13, 0.0  ;;  %v498_v21 = vadd.f32 %v1386_v35, %v497_v16  ;;  %v1117_v22 = vpop.f32.mrb[23].mxu1 }
 0x115   :  { %v963_v23 = vpack.c.bf16 %v558_v17, %v558_v17  ;;  %v559_v24 = vmax.f32 %v394_v18, 0.0  ;;  %v989_v25 = vpack.c.bf16 %v584_v20, %v584_v20  ;;  %v585_v26 = vmax.f32 %v498_v21, 0.0 }
 0x117   :  { %805 = vst.msk [vmem:[%s1636_s3 + $0x28] sm:$0xf] %vm794_vm4, %v963_v23  ;;  %v964_v27 = vpack.c.bf16 %v559_v24, %v559_v24  ;;  %831 = vst.msk [vmem:[%s1636_s3 + $0x90] sm:$0xf] %vm794_vm4, %v989_v25  ;;  %v990_v28 = vpack.c.bf16 %v585_v26, %v585_v26 }
 0x118   :  { %v398_v29 = vpop.f32.mrb[24].mxu0  ;;  %v502_v30 = vpop.f32.mrb[24].mxu1 }
 0x119   :  { %806 = vst.msk [vmem:[%s1636_s3 + $0x2c] sm:$0xf] %vm794_vm4, %v964_v27  ;;  %v399_v31 = vadd.f32 %v1386_v35, %v398_v29  ;;  %v1068_v32 = vpop.f32.mrb[25].mxu0  ;;  %832 = vst.msk [vmem:[%s1636_s3 + $0x94] sm:$0xf] %vm794_vm4, %v990_v28  ;;  %v503_v33 = vadd.f32 %v1386_v35, %v502_v30  ;;  %v1120_v34 = vpop.f32.mrb[25].mxu1 }
 0x11a   :  { %v401_v36 = vpop.f32.mrb[26].mxu0  ;;  %v505_v37 = vpop.f32.mrb[26].mxu1 }
 0x11b   :  { %v560_v38 = vmax.f32 %v399_v31, 0.0  ;;  %v402_v39 = vadd.f32 %v1386_v35, %v401_v36  ;;  %v1069_v40 = vpop.f32.mrb[27].mxu0  ;;  %v586_v41 = vmax.f32 %v503_v33, 0.0  ;;  %v506_v42 = vadd.f32 %v1386_v35, %v505_v37  ;;  %v1121_v43 = vpop.f32.mrb[27].mxu1 }
 0x11d   :  { %v965_v44 = vpack.c.bf16 %v560_v38, %v560_v38  ;;  %v561_v45 = vmax.f32 %v402_v39, 0.0  ;;  %v991_v46 = vpack.c.bf16 %v586_v41, %v586_v41  ;;  %v587_v47 = vmax.f32 %v506_v42, 0.0 }
 0x11f   :  { %807 = vst.msk [vmem:[%s1636_s3 + $0x30] sm:$0xf] %vm794_vm4, %v965_v44  ;;  %v966_v48 = vpack.c.bf16 %v561_v45, %v561_v45  ;;  %833 = vst.msk [vmem:[%s1636_s3 + $0x98] sm:$0xf] %vm794_vm4, %v991_v46  ;;  %v992_v49 = vpack.c.bf16 %v587_v47, %v587_v47 }
 0x120   :  { %v406_v50 = vpop.f32.mrb[28].mxu0  ;;  %v510_v51 = vpop.f32.mrb[28].mxu1 }
 0x121   :  { %808 = vst.msk [vmem:[%s1636_s3 + $0x34] sm:$0xf] %vm794_vm4, %v966_v48  ;;  %v407_v52 = vadd.f32 %v1386_v35, %v406_v50  ;;  %v1072_v53 = vpop.f32.mrb[29].mxu0  ;;  %834 = vst.msk [vmem:[%s1636_s3 + $0x9c] sm:$0xf] %vm794_vm4, %v992_v49  ;;  %v511_v54 = vadd.f32 %v1386_v35, %v510_v51  ;;  %v1124_v55 = vpop.f32.mrb[29].mxu1 }
 0x122   :  { %v409_v56 = vpop.f32.mrb[30].mxu0  ;;  %v513_v57 = vpop.f32.mrb[30].mxu1 }
 0x123   :  { %v562_v58 = vmax.f32 %v407_v52, 0.0  ;;  %v410_v59 = vadd.f32 %v1386_v35, %v409_v56  ;;  %v1073_v60 = vpop.f32.mrb[31].mxu0  ;;  %v588_v61 = vmax.f32 %v511_v54, 0.0  ;;  %v514_v62 = vadd.f32 %v1386_v35, %v513_v57  ;;  %v1125_v63 = vpop.f32.mrb[31].mxu1 }
 0x125   :  { %v967_v0 = vpack.c.bf16 %v562_v58, %v562_v58  ;;  %v563_v1 = vmax.f32 %v410_v59, 0.0  ;;  %v993_v2 = vpack.c.bf16 %v588_v61, %v588_v61  ;;  %v589_v3 = vmax.f32 %v514_v62, 0.0 }
 0x127   :  { %809 = vst.msk [vmem:[%s1636_s3 + $0x38] sm:$0xf] %vm794_vm4, %v967_v0  ;;  %v968_v4 = vpack.c.bf16 %v563_v1, %v563_v1  ;;  %835 = vst.msk [vmem:[%s1636_s3 + $0xa0] sm:$0xf] %vm794_vm4, %v993_v2  ;;  %v994_v5 = vpack.c.bf16 %v589_v3, %v589_v3 }
 0x128   :  { %v414_v6 = vpop.f32.mrb[32].mxu0  ;;  %v518_v7 = vpop.f32.mrb[32].mxu1 }
 0x129   :  { %810 = vst.msk [vmem:[%s1636_s3 + $0x3c] sm:$0xf] %vm794_vm4, %v968_v4  ;;  %v415_v8 = vadd.f32 %v1386_v35, %v414_v6  ;;  %v1076_v9 = vpop.f32.mrb[33].mxu0  ;;  %836 = vst.msk [vmem:[%s1636_s3 + $0xa4] sm:$0xf] %vm794_vm4, %v994_v5  ;;  %v519_v10 = vadd.f32 %v1386_v35, %v518_v7  ;;  %v1128_v11 = vpop.f32.mrb[33].mxu1 }
 0x12a   :  { %v417_v12 = vpop.f32.mrb[34].mxu0  ;;  %v521_v13 = vpop.f32.mrb[34].mxu1 }
 0x12b   :  { %v564_v14 = vmax.f32 %v415_v8, 0.0  ;;  %v418_v15 = vadd.f32 %v1386_v35, %v417_v12  ;;  %v1077_v16 = vpop.f32.mrb[35].mxu0  ;;  %v590_v17 = vmax.f32 %v519_v10, 0.0  ;;  %v522_v18 = vadd.f32 %v1386_v35, %v521_v13  ;;  %v1129_v19 = vpop.f32.mrb[35].mxu1 }
 0x12d   :  { %v969_v20 = vpack.c.bf16 %v564_v14, %v564_v14  ;;  %v565_v21 = vmax.f32 %v418_v15, 0.0  ;;  %v995_v22 = vpack.c.bf16 %v590_v17, %v590_v17  ;;  %v591_v23 = vmax.f32 %v522_v18, 0.0 }
 0x12f   :  { %811 = vst.msk [vmem:[%s1636_s3 + $0x40] sm:$0xf] %vm794_vm4, %v969_v20  ;;  %v970_v24 = vpack.c.bf16 %v565_v21, %v565_v21  ;;  %837 = vst.msk [vmem:[%s1636_s3 + $0xa8] sm:$0xf] %vm794_vm4, %v995_v22  ;;  %v996_v25 = vpack.c.bf16 %v591_v23, %v591_v23 }
 0x130   :  { %v422_v26 = vpop.f32.mrb[36].mxu0  ;;  %v526_v27 = vpop.f32.mrb[36].mxu1 }
 0x131   :  { %812 = vst.msk [vmem:[%s1636_s3 + $0x44] sm:$0xf] %vm794_vm4, %v970_v24  ;;  %v423_v28 = vadd.f32 %v1386_v35, %v422_v26  ;;  %v1080_v29 = vpop.f32.mrb[37].mxu0  ;;  %838 = vst.msk [vmem:[%s1636_s3 + $0xac] sm:$0xf] %vm794_vm4, %v996_v25  ;;  %v527_v30 = vadd.f32 %v1386_v35, %v526_v27  ;;  %v1132_v31 = vpop.f32.mrb[37].mxu1 }
 0x132   :  { %v425_v32 = vpop.f32.mrb[38].mxu0  ;;  %v529_v33 = vpop.f32.mrb[38].mxu1 }
 0x133   :  { %v566_v34 = vmax.f32 %v423_v28, 0.0  ;;  %v426_v36 = vadd.f32 %v1386_v35, %v425_v32  ;;  %v1081_v37 = vpop.f32.mrb[39].mxu0  ;;  %v592_v38 = vmax.f32 %v527_v30, 0.0  ;;  %v530_v39 = vadd.f32 %v1386_v35, %v529_v33  ;;  %v1133_v40 = vpop.f32.mrb[39].mxu1 }
 0x135   :  { %v971_v41 = vpack.c.bf16 %v566_v34, %v566_v34  ;;  %v567_v42 = vmax.f32 %v426_v36, 0.0  ;;  %v997_v43 = vpack.c.bf16 %v592_v38, %v592_v38  ;;  %v593_v44 = vmax.f32 %v530_v39, 0.0 }
 0x137   :  { %813 = vst.msk [vmem:[%s1636_s3 + $0x48] sm:$0xf] %vm794_vm4, %v971_v41  ;;  %v972_v45 = vpack.c.bf16 %v567_v42, %v567_v42  ;;  %839 = vst.msk [vmem:[%s1636_s3 + $0xb0] sm:$0xf] %vm794_vm4, %v997_v43  ;;  %v998_v46 = vpack.c.bf16 %v593_v44, %v593_v44 }
 0x138   :  { %v430_v47 = vpop.f32.mrb[40].mxu0  ;;  %v534_v48 = vpop.f32.mrb[40].mxu1 }
 0x139   :  { %814 = vst.msk [vmem:[%s1636_s3 + $0x4c] sm:$0xf] %vm794_vm4, %v972_v45  ;;  %v431_v49 = vadd.f32 %v1386_v35, %v430_v47  ;;  %v1084_v50 = vpop.f32.mrb[41].mxu0  ;;  %840 = vst.msk [vmem:[%s1636_s3 + $0xb4] sm:$0xf] %vm794_vm4, %v998_v46  ;;  %v535_v51 = vadd.f32 %v1386_v35, %v534_v48  ;;  %v1136_v52 = vpop.f32.mrb[41].mxu1 }
 0x13a   :  { %v433_v53 = vpop.f32.mrb[42].mxu0  ;;  %v537_v54 = vpop.f32.mrb[42].mxu1 }
 0x13b   :  { %v568_v55 = vmax.f32 %v431_v49, 0.0  ;;  %v434_v56 = vadd.f32 %v1386_v35, %v433_v53  ;;  %v1085_v57 = vpop.f32.mrb[43].mxu0  ;;  %v594_v58 = vmax.f32 %v535_v51, 0.0  ;;  %v538_v59 = vadd.f32 %v1386_v35, %v537_v54  ;;  %v1137_v60 = vpop.f32.mrb[43].mxu1 }
 0x13d   :  { %v973_v61 = vpack.c.bf16 %v568_v55, %v568_v55  ;;  %v569_v62 = vmax.f32 %v434_v56, 0.0  ;;  %v999_v63 = vpack.c.bf16 %v594_v58, %v594_v58  ;;  %v595_v0 = vmax.f32 %v538_v59, 0.0 }
 0x13f   :  { %815 = vst.msk [vmem:[%s1636_s3 + $0x50] sm:$0xf] %vm794_vm4, %v973_v61  ;;  %v974_v1 = vpack.c.bf16 %v569_v62, %v569_v62  ;;  %841 = vst.msk [vmem:[%s1636_s3 + $0xb8] sm:$0xf] %vm794_vm4, %v999_v63  ;;  %v1000_v2 = vpack.c.bf16 %v595_v0, %v595_v0 }
 0x140   :  { %v438_v3 = vpop.f32.mrb[44].mxu0  ;;  %v542_v4 = vpop.f32.mrb[44].mxu1 }
 0x141   :  { %816 = vst.msk [vmem:[%s1636_s3 + $0x54] sm:$0xf] %vm794_vm4, %v974_v1  ;;  %v439_v5 = vadd.f32 %v1386_v35, %v438_v3  ;;  %v1088_v6 = vpop.f32.mrb[45].mxu0  ;;  %842 = vst.msk [vmem:[%s1636_s3 + $0xbc] sm:$0xf] %vm794_vm4, %v1000_v2  ;;  %v543_v7 = vadd.f32 %v1386_v35, %v542_v4  ;;  %v1140_v8 = vpop.f32.mrb[45].mxu1 }
 0x142   :  { %v441_v9 = vpop.f32.mrb[46].mxu0  ;;  %v545_v10 = vpop.f32.mrb[46].mxu1 }
 0x143   :  { %v570_v11 = vmax.f32 %v439_v5, 0.0  ;;  %v442_v12 = vadd.f32 %v1386_v35, %v441_v9  ;;  %v1089_v13 = vpop.f32.mrb[47].mxu0  ;;  %v596_v14 = vmax.f32 %v543_v7, 0.0  ;;  %v1141_v15 = vpop.f32.mrb[47].mxu1 }
 0x145   :  { %v975_v16 = vpack.c.bf16 %v570_v11, %v570_v11  ;;  %v571_v17 = vmax.f32 %v442_v12, 0.0  ;;  %v1001_v18 = vpack.c.bf16 %v596_v14, %v596_v14 }
 0x147   :  { %817 = vst.msk [vmem:[%s1636_s3 + $0x58] sm:$0xf] %vm794_vm4, %v975_v16  ;;  %v976_v19 = vpack.c.bf16 %v571_v17, %v571_v17  ;;  %843 = vst.msk [vmem:[%s1636_s3 + $0xc0] sm:$0xf] %vm794_vm4, %v1001_v18 }
 0x148   :  { %v446_v20 = vpop.f32.mrb[48].mxu0 }
 0x149   :  { %818 = vst.msk [vmem:[%s1636_s3 + $0x5c] sm:$0xf] %vm794_vm4, %v976_v19  ;;  %v447_v21 = vadd.f32 %v1386_v35, %v446_v20  ;;  %v1092_v22 = vpop.f32.mrb[49].mxu0 }
 0x14a   :  { %v449_v23 = vpop.f32.mrb[50].mxu0 }
 0x14b   :  { %v572_v24 = vmax.f32 %v447_v21, 0.0  ;;  %v450_v25 = vadd.f32 %v1386_v35, %v449_v23  ;;  %v1093_v26 = vpop.f32.mrb[51].mxu0 }
 0x14d   :  { %v977_v27 = vpack.c.bf16 %v572_v24, %v572_v24  ;;  %v573_v28 = vmax.f32 %v450_v25, 0.0 }
 0x14f   :  { %819 = vst.msk [vmem:[%s1636_s3 + $0x60] sm:$0xf] %vm794_vm4, %v977_v27  ;;  %v978_v29 = vpack.c.bf16 %v573_v28, %v573_v28 }
 0x151   :  { %820 = vst.msk [vmem:[%s1636_s3 + $0x64] sm:$0xf] %vm794_vm4, %v978_v29 }

// kernel: dqn_forward.3
= control target key start
LH: loop header
LB: loop body
LE: loop exit
PB: predicated region body
PF: predicated region fallthrough
CT: control target
= control target key end

     0   :  { %v2785_v1 = vmov 0   ;;  %vm319_vm0 = vcmask 130048   ;;  %v2786_v32 = vmov 0.0   ;;  %s3299_s0 = inlined_call_operand.vmem [shape: bf16[50,400], index: 0, kind: input, shape index: {}]   ;;  %s3300_s1 = inlined_call_operand.vmem [shape: bf16[400,32], index: 1, kind: input, shape index: {}]   ;;  %s3301_s2 = inlined_call_operand.vmem [shape: f32[1,32], index: 2, kind: input, shape index: {}]   ;;  %s3302_s3 = inlined_call_operand.vmem [shape: bf16[25,32,32], index: 3, kind: input, shape index: {}]   ;;  %s3303_s4 = inlined_call_operand.vmem [shape: f32[1,32], index: 4, kind: input, shape index: {}]   ;;  %s3304_s5 = inlined_call_operand.vmem [shape: bf16[1,32,4], index: 5, kind: input, shape index: {}]   ;;  %s3305_s6 = inlined_call_operand.vmem [shape: f32[1,4], index: 6, kind: input, shape index: {}]   ;;  %s3306_s7 = inlined_call_operand.hbm [shape: f32[2,4], index: 7, kind: output, shape index: {}]  }
   0x1   :  { %v2662_v0 = vld [vmem:[%s3300_s1 + $0x40] sm:$0xff]   ;;  %396 = vmatprep.subr.bf16.mxu1 %v2785_v1  ;;  %v2665_v4 = vld [vmem:[%s3300_s1 + $0x48] sm:$0xff]   ;;  %v2668_v7 = vld [vmem:[%s3300_s1 + $0x50] sm:$0xff]  }
   0x2   :  { %v2663_v2 = vld [vmem:[%s3300_s1 + $0x80] sm:$0xff]   ;;  %2332 = vmatprep.subr.bf16.mxu0 %v2662_v0  ;;  %v2666_v5 = vld [vmem:[%s3300_s1 + $0x88] sm:$0xff]   ;;  %v2669_v8 = vld [vmem:[%s3300_s1 + $0x90] sm:$0xff]  }
   0x3   :  { %v2664_v3 = vld [vmem:[%s3300_s1] sm:$0xff]   ;;  %397 = vmatpush1.bf16.msra.mxu1 %v2663_v2  ;;  %v2667_v6 = vld [vmem:[%s3300_s1 + $0x8] sm:$0xff]   ;;  %v2670_v9 = vld [vmem:[%s3300_s1 + $0x10] sm:$0xff]  }
   0x4   :  { %2333 = vmatpush3.bf16.msra.mxu0 %v2664_v3  ;;  %398 = vmatprep.subr.bf16.mxu1 %v2785_v1  ;;  %v2671_v10 = vld [vmem:[%s3300_s1 + $0x58] sm:$0xff]   ;;  %v2674_v13 = vld [vmem:[%s3300_s1 + $0x60] sm:$0xff]   ;;  %v2677_v16 = vld [vmem:[%s3300_s1 + $0x68] sm:$0xff]  }
   0x5   :  { %2334 = vmatprep.subr.bf16.mxu0 %v2665_v4  ;;  %v2672_v11 = vld [vmem:[%s3300_s1 + $0x98] sm:$0xff]   ;;  %v2675_v14 = vld [vmem:[%s3300_s1 + $0xa0] sm:$0xff]   ;;  %v2678_v17 = vld [vmem:[%s3300_s1 + $0xa8] sm:$0xff]  }
   0x6   :  { %v2673_v12 = vld [vmem:[%s3300_s1 + $0x18] sm:$0xff]   ;;  %v2676_v15 = vld [vmem:[%s3300_s1 + $0x20] sm:$0xff]   ;;  %v2679_v18 = vld [vmem:[%s3300_s1 + $0x28] sm:$0xff]  }
   0x7   :  { %399 = vmatpush1.bf16.msra.mxu1 %v2666_v5  ;;  %v2680_v19 = vld [vmem:[%s3300_s1 + $0x70] sm:$0xff]   ;;  %v2683_v22 = vld [vmem:[%s3300_s1 + $0x78] sm:$0xff]   ;;  %v2689_v28 = vld [vmem:[%s3300_s1 + $0xc0] sm:$0xff]  }
   0x8   :  { %2335 = vmatpush3.bf16.msra.mxu0 %v2667_v6  ;;  %400 = vmatprep.subr.bf16.mxu1 %v2785_v1  ;;  %v2681_v20 = vld [vmem:[%s3300_s1 + $0xb0] sm:$0xff]   ;;  %v2684_v24 = vld [vmem:[%s3300_s1 + $0xb8] sm:$0xff]   ;;  %v2710_v34 = vld [vmem:[%s3302_s3] sm:$0xff]  }
   0x9   :  { %2336 = vmatprep.subr.bf16.mxu0 %v2668_v7  ;;  %v2682_v21 = vld [vmem:[%s3300_s1 + $0x30] sm:$0xff]   ;;  %v2692_v25 = vld [vmem:[%s3299_s0 + $0xc] ss:$16 sps:$4 sm:$0xff]   ;;  %v2690_v30 = vld [vmem:[%s3299_s0 + $0x8] ss:$16 sps:$4 sm:$0xff]  }
   0xa   :  { %v2688_v23 = vld [vmem:[%s3299_s0 + $0x4] ss:$16 sps:$4 sm:$0xff]   ;;  %v2685_v26 = vld [vmem:[%s3300_s1 + $0x38] sm:$0xff]   ;;  %2152 = vmatprep.mubr.msk.bf16.mxu1 %vm319_vm0, %v2692_v25  ;;  %v2686_v27 = vld [vmem:[%s3299_s0] ss:$16 sps:$4 sm:$0xff]  }
   0xb   :  { %401 = vmatpush1.bf16.msra.mxu1 %v2669_v8  ;;  %364 = vmatprep.mubr.bf16.mxu0 %v2688_v23  ;;  %v2693_v29 = vld [vmem:[%s3299_s0 + $0x24] ss:$16 sps:$4 sm:$0xff]   ;;  %v2696_v31 = vld [vmem:[%s3299_s0 + $0x2c] ss:$16 sps:$4 sm:$0xff]   ;;  %v2695_v35 = vld [vmem:[%s3299_s0 + $0x20] ss:$16 sps:$4 sm:$0xff]  }
   0xc   :  { %2337 = vmatpush3.bf16.msra.mxu0 %v2670_v9  ;;  %402 = vmatprep.subr.bf16.mxu1 %v2785_v1  ;;  %v2709_v33 = vld [vmem:[%s3302_s3 + $0x10] sm:$0xff]   ;;  %v2698_v37 = vld [vmem:[%s3299_s0 + $0x28] ss:$16 sps:$4 sm:$0xff]   ;;  %v2702_v38 = vld [vmem:[%s3299_s0 + $0x4c] ss:$16 sps:$4 sm:$0xff]  }
   0xd   :  { %2338 = vmatprep.subr.bf16.mxu0 %v2671_v10  ;;  %v2699_v36 = vld [vmem:[%s3299_s0 + $0x44] ss:$16 sps:$4 sm:$0xff]   ;;  %v2701_v40 = vld [vmem:[%s3299_s0 + $0x40] ss:$16 sps:$4 sm:$0xff]   ;;  %v41_v41 = vld [vmem:[%s3299_s0 + $0x68] sm:$0x11] }
   0xe   :  { %v40_v39 = vld [vmem:[%s3299_s0 + $0x60] sm:$0x11]  ;;  %v2704_v42 = vld [vmem:[%s3299_s0 + $0x48] ss:$16 sps:$4 sm:$0xff]   ;;  %v2126_v44 = vcombine.high %v41_v41, %v41_v41  ;;  %v2125_v46 = vcombine.low %v41_v41, %v41_v41 }
   0xf   :  { %403 = vmatpush1.bf16.msra.mxu1 %v2672_v11  ;;  %v2124_v43 = vcombine.high %v40_v39, %v40_v39  ;;  %v2123_v45 = vcombine.low %v40_v39, %v40_v39 }
  0x10   :  { %2339 = vmatpush3.bf16.msra.mxu0 %v2673_v12  ;;  %404 = vmatprep.subr.bf16.mxu1 %v2785_v1 }
  0x11   :  { %2340 = vmatprep.subr.bf16.mxu0 %v2674_v13 }
  0x13   :  { %405 = vmatpush1.bf16.msra.mxu1 %v2675_v14 }
  0x14   :  { %2341 = vmatpush3.bf16.msra.mxu0 %v2676_v15  ;;  %406 = vmatprep.subr.bf16.mxu1 %v2785_v1 }
  0x15   :  { %2342 = vmatprep.subr.bf16.mxu0 %v2677_v16 }
  0x17   :  { %407 = vmatpush1.bf16.msra.mxu1 %v2678_v17 }
  0x18   :  { %2343 = vmatpush3.bf16.msra.mxu0 %v2679_v18  ;;  %408 = vmatprep.subr.bf16.mxu1 %v2785_v1 }
  0x19   :  { %2344 = vmatprep.subr.bf16.mxu0 %v2680_v19 }
  0x1b   :  { %409 = vmatpush1.bf16.msra.mxu1 %v2681_v20 }
  0x1c   :  { %2345 = vmatpush3.bf16.msra.mxu0 %v2682_v21  ;;  %410 = vmatprep.subr.bf16.mxu1 %v2785_v1 }
  0x1d   :  { %2346 = vmatprep.subr.bf16.mxu0 %v2683_v22 }
  0x1f   :  { %411 = vmatpush1.bf16.msra.mxu1 %v2684_v24 }
  0x20   :  { %2347 = vmatpush3.bf16.msra.mxu0 %v2685_v26  ;;  %412 = vmatprep.subr.bf16.mxu1 %v2785_v1 }
  0x21   :  { %2450 = vmatprep.subr.bf16.mxu0 %v2786_v32 }
  0x23   :  { %365 = vmatmul.mubr.bf16.vlgmr.msra.gmra.mrb[0].mxu0 %v2686_v27  ;;  %413 = vmatpush1.bf16.msra.mxu1 %v2689_v28 }
  0x24   :  { %372 = vmatprep.mubr.bf16.mxu0 %v2693_v29  ;;  %2451 = vmatpush3.bf16.msra.mxu0 %v2709_v33 }
  0x25   :  { %2458 = vmatprep.subr.bf16.mxu1 %v2786_v32  ;;  %2452 = vmatprep.subr.bf16.mxu0 %v2786_v32 }
  0x26   :  { %429 = vmatmul.mubr.bf16.vlgmr.msra.gmra.mrb[0].mxu1 %v2690_v30 }
  0x27   :  { %2153 = vmatprep.mubr.msk.bf16.mxu1 %vm319_vm0, %v2696_v31  ;;  %2459 = vmatpush3.bf16.msra.mxu1 %v2710_v34 }
  0x28   :  { %2460 = vmatprep.subr.bf16.mxu1 %v2786_v32 }
  0x2b   :  { %373 = vmatmul.mubr.bf16.gmra.mrb[4].mxu0 %v2695_v35 }
  0x2c   :  { %380 = vmatprep.mubr.bf16.mxu0 %v2699_v36 }
  0x2e   :  { %437 = vmatmul.mubr.bf16.gmra.mrb[4].mxu1 %v2698_v37 }
  0x2f   :  { %2154 = vmatprep.mubr.msk.bf16.mxu1 %vm319_vm0, %v2702_v38 }
  0x33   :  { %381 = vmatmul.mubr.bf16.gmra.mrb[8].mxu0 %v2701_v40 }
  0x34   :  { %388 = vmatprep.mubr.bf16.mxu0 %v2124_v43 }
  0x36   :  { %445 = vmatmul.mubr.bf16.gmra.mrb[8].mxu1 %v2704_v42 }
  0x37   :  { %2155 = vmatprep.mubr.msk.bf16.mxu1 %vm319_vm0, %v2126_v44 }
  0x3b   :  { %389 = vmatmul.mubr.bf16.gmra.mrb[12].mxu0 %v2123_v45 }
  0x3e   :  { %453 = vmatmul.mubr.bf16.gmra.mrb[12].mxu1 %v2125_v46 }
  0x3f   :  { %12 = vsyncpa [#allocation3], 0  ;;  %v2711_v47 = vld [vmem:[%s3302_s3 + $0x18] sm:$0xff]   ;;  %v2712_v48 = vld [vmem:[%s3302_s3 + $0x8] sm:$0xff]   ;;  %vm2787_vm1 = vmmov 0   ;;  %vm494_vm2 = vcmask 261120  }
  0x40   :  { %2453 = vmatpush3.bf16.msra.mxu0 %v2711_v47  ;;  %2461 = vmatpush3.bf16.msra.mxu1 %v2712_v48  ;;  %v2975_v51 = vld [vmem:[%s3301_s2] ss:$0 sm:$0xff]  ;;  %v2713_v6 = vld [vmem:[%s3302_s3 + $0x30] sm:$0xff]   ;;  %v2715_v17 = vld [vmem:[%s3302_s3 + $0x38] sm:$0xff]   ;;  %s2788_s13 = smov [#allocation2]   ;;  %vm2094_vm3 = vcmask 25600  }
  0x41   :  { %2466 = vmatprep.subr.bf16.mxu0 %v2786_v32  ;;  %2474 = vmatprep.subr.bf16.mxu1 %v2786_v32  ;;  %v2714_v13 = vld [vmem:[%s3302_s3 + $0x20] sm:$0xff]   ;;  %v2716_v21 = vld [vmem:[%s3302_s3 + $0x28] sm:$0xff]   ;;  %v2717_v27 = vld [vmem:[%s3302_s3 + $0x50] sm:$0xff]   ;;  %s2102_s14 = sshll.u32 %s2788_s13, 4  ;;  %s2103_s14 = int_to_ptr.vmem [resolvable:$true] %s2102_s14 }
  0x42   :  { %2462 = vmatprep.mubr.msk.bf16.mxu1 %vm2787_vm1, %v2786_v32  ;;  %2454 = vmatprep.mubr.msk.bf16.mxu0 %vm2787_vm1, %v2786_v32  ;;  %v2718_v36 = vld [vmem:[%s3302_s3 + $0x40] sm:$0xff]   ;;  %v2719_v43 = vld [vmem:[%s3302_s3 + $0x58] sm:$0xff]   ;;  %v2720_v47 = vld [vmem:[%s3302_s3 + $0x48] sm:$0xff]   ;;  %p2766_p1 = scmp.lt.s32.totalorder %s2103_s14, %s2103_s14 }
  0xf6   :  { %v2348_v49 = vpop.f32.mrb[0].mxu0 }
  0xf7   :  { %v2349_v50 = vpop.f32.mrb[1].mxu0 }
  0xf8   :  { %v2350_v52 = vadd.f32 %v2349_v50, %v2348_v49  ;;  %v2351_v53 = vpop.f32.mrb[2].mxu0 }
  0xf9   :  { %v2352_v54 = vpop.f32.mrb[3].mxu0  ;;  %v430_v55 = vpop.f32.mrb[0].mxu1 }
  0xfa   :  { %v2353_v56 = vadd.f32 %v2352_v54, %v2351_v53  ;;  %v367_v57 = vadd.f32 %v2350_v52, %v2975_v51  ;;  %v432_v58 = vpop.f32.mrb[1].mxu1  ;;  %v2721_v53 = vld [vmem:[%s3302_s3 + $0x70] sm:$0xff]  }
  0xfb   :  { %v433_v59 = vpop.f32.mrb[2].mxu1 }
  0xfc   :  { %v431_v60 = vadd.f32 %v430_v55, %v367_v57  ;;  %v370_v61 = vadd.f32 %v2353_v56, %v2975_v51  ;;  %v435_v62 = vpop.f32.mrb[3].mxu1 }
  0xfe   :  { %v434_v63 = vadd.f32 %v433_v59, %v370_v61  ;;  %v2354_v0 = vpop.f32.mrb[4].mxu0  ;;  %v460_v2 = vmax.f32 %v431_v60, 0.0  ;;  %v2722_v60 = vld [vmem:[%s3302_s3 + $0x60] sm:$0xff]  }
  0xff   :  { %v2355_v1 = vpop.f32.mrb[5].mxu0 }
 0x100   :  { %v461_v3 = vmax.f32 %v434_v63, 0.0  ;;  %v2356_v4 = vadd.f32 %v2355_v1, %v2354_v0  ;;  %v2357_v5 = vpop.f32.mrb[6].mxu0  ;;  %v2723_v0 = vld [vmem:[%s3302_s3 + $0x78] sm:$0xff]   ;;  %v2724_v1 = vld [vmem:[%s3302_s3 + $0x68] sm:$0xff]  }
 0x101   :  { %v2358_v7 = vpop.f32.mrb[7].mxu0  ;;  %v438_v8 = vpop.f32.mrb[4].mxu1 }
 0x102   :  { %v2982_v9 = vpack.c.bf16 %v461_v3, %v460_v2  ;;  %v2359_v10 = vadd.f32 %v2358_v7, %v2357_v5  ;;  %v375_v11 = vadd.f32 %v2356_v4, %v2975_v51  ;;  %v440_v12 = vpop.f32.mrb[5].mxu1  ;;  %v2725_v2 = vld [vmem:[%s3302_s3 + $0x90] sm:$0xff]   ;;  %v2726_v4 = vld [vmem:[%s3302_s3 + $0x80] sm:$0xff]   ;;  %v2728_v7 = vld [vmem:[%s3302_s3 + $0x88] sm:$0xff]  }
 0x103   :  { %v441_v14 = vpop.f32.mrb[6].mxu1  ;;  %v2732_v12 = vld [vmem:[%s3302_s3 + $0xa8] sm:$0xff]  }
 0x104   :  { %2463 = vmatmul.mubr.msk.bf16.vlgmr.msra.gmra.mrb[16].mxu1 %vm494_vm2, %v2982_v9  ;;  %v481_v15 = vrot.slane %v2982_v9, 1  ;;  %v443_v16 = vpop.f32.mrb[7].mxu1  ;;  %v439_v18 = vadd.f32 %v438_v8, %v375_v11  ;;  %v378_v19 = vadd.f32 %v2359_v10, %v2975_v51  ;;  %v660_v31 = vrot.slane %v2982_v9, 3  ;;  %v2730_v10 = vld [vmem:[%s3302_s3 + $0xa0] sm:$0xff]   ;;  %v2731_v11 = vld [vmem:[%s3302_s3 + $0xb8] sm:$0xff]  }
 0x105   :  { %2475 = vmatpush3.bf16.msra.mxu1 %v2713_v6  ;;  %2478 = vmatprep.mubr.msk.bf16.mxu1 %vm2787_vm1, %v2786_v32  ;;  %v598_v39 = vrot.slane %v2982_v9, 2  ;;  %v784_v56 = vrot.slane %v2982_v9, 5  ;;  %v722_v62 = vrot.slane %v2982_v9, 4  ;;  %v908_v3 = vrot.slane %v2982_v9, 7  ;;  %v2727_v6 = vld [vmem:[%s3302_s3 + $0x98] sm:$0xff]  }
 0x106   :  { %2455 = vmatmul.mubr.msk.bf16.vlgmr.msra.gmra.mrb[16].mxu0 %vm494_vm2, %v481_v15  ;;  %2476 = vmatprep.subr.bf16.mxu1 %v2786_v32  ;;  %v2360_v20 = vpop.f32.mrb[8].mxu0  ;;  %v462_v22 = vmax.f32 %v439_v18, 0.0  ;;  %v442_v23 = vadd.f32 %v441_v14, %v378_v19  ;;  %v846_v5 = vrot.slane %v2982_v9, 6  ;;  %v2729_v9 = vld [vmem:[%s3302_s3 + $0xb0] sm:$0xff]   ;;  %v2734_v15 = vld [vmem:[%s3302_s3 + $0xc0] sm:$0xff]   ;;  %v2736_v18 = vld [vmem:[%s3302_s3 + $0xc8] sm:$0xff]  }
 0x107   :  { %2467 = vmatpush3.bf16.msra.mxu0 %v2714_v13  ;;  %2470 = vmatprep.mubr.msk.bf16.mxu0 %vm2787_vm1, %v2786_v32  ;;  %v2361_v24 = vpop.f32.mrb[9].mxu0  ;;  %v2733_v13 = vld [vmem:[%s3302_s3 + $0xd0] sm:$0xff]  }
 0x108   :  { %2468 = vmatprep.subr.bf16.mxu0 %v2786_v32  ;;  %v2362_v25 = vadd.f32 %v2361_v24, %v2360_v20  ;;  %v2363_v26 = vpop.f32.mrb[10].mxu0  ;;  %v463_v28 = vmax.f32 %v442_v23, 0.0  ;;  %v2737_v19 = vld [vmem:[%s3302_s3 + $0xf0] sm:$0xff]   ;;  %v2739_v23 = vld [vmem:[%s3302_s3 + $0xf8] sm:$0xff]   ;;  %v2740_v24 = vld [vmem:[%s3302_s3 + $0xe8] sm:$0xff]  }
 0x109   :  { %2477 = vmatpush3.bf16.msra.mxu1 %v2715_v17  ;;  %v2364_v29 = vpop.f32.mrb[11].mxu0  ;;  %v446_v30 = vpop.f32.mrb[8].mxu1  ;;  %v2735_v17 = vld [vmem:[%s3302_s3 + $0xd8] sm:$0xff]  }
 0x10a   :  { %2490 = vmatprep.subr.bf16.mxu1 %v2786_v32  ;;  %v2365_v33 = vadd.f32 %v2364_v29, %v2363_v26  ;;  %v383_v34 = vadd.f32 %v2362_v25, %v2975_v51  ;;  %v448_v35 = vpop.f32.mrb[9].mxu1  ;;  %v3014_v37 = vpack.c.bf16 %v463_v28, %v462_v22  ;;  %v2741_v25 = vld [vmem:[%s3302_s3 + $0x110] sm:$0xff]   ;;  %v2743_v29 = vld [vmem:[%s3302_s3 + $0x118] sm:$0xff]  }
 0x10b   :  { %2469 = vmatpush3.bf16.msra.mxu0 %v2716_v21  ;;  %v449_v38 = vpop.f32.mrb[10].mxu1  ;;  %v2738_v21 = vld [vmem:[%s3302_s3 + $0xe0] sm:$0xff]   ;;  %v2747_v35 = vld [vmem:[%s3302_s3 + $0x138] sm:$0xff]  }
 0x10c   :  { %2479 = vmatmul.mubr.msk.bf16.vlgmr.msra.gmra.mrb[20].mxu1 %vm494_vm2, %v660_v31  ;;  %2482 = vmatprep.subr.bf16.mxu0 %v2786_v32  ;;  %v447_v40 = vadd.f32 %v446_v30, %v383_v34  ;;  %v386_v41 = vadd.f32 %v2365_v33, %v2975_v51  ;;  %v451_v42 = vpop.f32.mrb[11].mxu1  ;;  %v1032_v8 = vrot.slane %v3014_v37, 1  ;;  %v1156_v14 = vrot.slane %v3014_v37, 3  ;;  %v2744_v30 = vld [vmem:[%s3302_s3 + $0x108] sm:$0xff]   ;;  %v2745_v33 = vld [vmem:[%s3302_s3 + $0x130] sm:$0xff]   ;;  %v2746_v34 = vld [vmem:[%s3302_s3 + $0x120] sm:$0xff]  }
 0x10d   :  { %2491 = vmatpush3.bf16.msra.mxu1 %v2717_v27  ;;  %2494 = vmatprep.mubr.msk.bf16.mxu1 %vm2787_vm1, %v2786_v32  ;;  %v1094_v16 = vrot.slane %v3014_v37, 2  ;;  %v1280_v20 = vrot.slane %v3014_v37, 5  ;;  %v1218_v22 = vrot.slane %v3014_v37, 4  ;;  %v1404_v26 = vrot.slane %v3014_v37, 7  ;;  %v2742_v27 = vld [vmem:[%s3302_s3 + $0x100] sm:$0xff]   ;;  %v2752_v42 = vld [vmem:[%s3302_s3 + $0x148] sm:$0xff]  }
 0x10e   :  { %2471 = vmatmul.mubr.msk.bf16.vlgmr.msra.gmra.mrb[20].mxu0 %vm494_vm2, %v598_v39  ;;  %2492 = vmatprep.subr.bf16.mxu1 %v2786_v32  ;;  %v464_v44 = vmax.f32 %v447_v40, 0.0  ;;  %v450_v45 = vadd.f32 %v449_v38, %v386_v41  ;;  %v2366_v46 = vpop.f32.mrb[12].mxu0  ;;  %v1342_v28 = vrot.slane %v3014_v37, 6  ;;  %v2750_v39 = vld [vmem:[%s3302_s3 + $0x140] sm:$0xff]   ;;  %v2751_v41 = vld [vmem:[%s3302_s3 + $0x158] sm:$0xff]  }
 0x10f   :  { %2483 = vmatpush3.bf16.msra.mxu0 %v2718_v36  ;;  %2486 = vmatprep.mubr.msk.bf16.mxu0 %vm2787_vm1, %v2786_v32  ;;  %v2367_v48 = vpop.f32.mrb[13].mxu0  ;;  %v2748_v36 = vld [vmem:[%s3302_s3 + $0x128] sm:$0xff]  }
 0x110   :  { %2484 = vmatprep.subr.bf16.mxu0 %v2786_v32  ;;  %v465_v49 = vmax.f32 %v450_v45, 0.0  ;;  %v2368_v50 = vadd.f32 %v2367_v48, %v2366_v46  ;;  %v2369_v52 = vpop.f32.mrb[14].mxu0  ;;  %v2754_v45 = vld [vmem:[%s3302_s3 + $0x160] sm:$0xff]   ;;  %v2756_v48 = vld [vmem:[%s3302_s3 + $0x168] sm:$0xff]  }
 0x111   :  { %2493 = vmatpush3.bf16.msra.mxu1 %v2719_v43  ;;  %v2370_v54 = vpop.f32.mrb[15].mxu0  ;;  %v454_v55 = vpop.f32.mrb[12].mxu1  ;;  %v2753_v43 = vld [vmem:[%s3302_s3 + $0x170] sm:$0xff]  }
 0x112   :  { %2506 = vmatprep.subr.bf16.mxu1 %v2786_v32  ;;  %v3038_v57 = vpack.c.bf16 %v465_v49, %v464_v44  ;;  %v391_v58 = vadd.f32 %v2368_v50, %v2975_v51  ;;  %v456_v59 = vpop.f32.mrb[13].mxu1  ;;  %v2757_v50 = vld [vmem:[%s3302_s3 + $0x180] sm:$0xff]   ;;  %v2758_v54 = vld [vmem:[%s3302_s3 + $0x188] sm:$0xff]  }
 0x113   :  { %2485 = vmatpush3.bf16.msra.mxu0 %v2720_v47  ;;  %v457_v61 = vpop.f32.mrb[14].mxu1  ;;  %v2755_v47 = vld [vmem:[%s3302_s3 + $0x178] sm:$0xff]  }
 0x114   :  { %2495 = vmatmul.mubr.msk.bf16.vlgmr.msra.gmra.mrb[24].mxu1 %vm494_vm2, %v784_v56  ;;  %2498 = vmatprep.subr.bf16.mxu0 %v2786_v32  ;;  %v458_v63 = vpop.f32.mrb[15].mxu1  ;;  %v3052_v51 = vadd.f32 %v454_v55, %v391_v58  ;;  %v1528_v31 = vrot.slane %v3038_v57, 1  ;;  %v1652_v38 = vrot.slane %v3038_v57, 3  ;;  %v1590_v40 = vrot.slane %v3038_v57, 2  ;;  %v2759_v56 = vld [vmem:[%s3304_s5] sm:$0xff]  }
 0x115   :  { %2507 = vmatpush3.bf16.msra.mxu1 %v2721_v53  ;;  %2510 = vmatprep.mubr.msk.bf16.mxu1 %vm2787_vm1, %v2786_v32  ;;  %v1776_v44 = vrot.slane %v3038_v57, 5  ;;  %v1714_v46 = vrot.slane %v3038_v57, 4  ;;  %v1900_v49 = vrot.slane %v3038_v57, 7  ;;  %v1838_v52 = vrot.slane %v3038_v57, 6 }
 0x116   :  { %2487 = vmatmul.mubr.msk.bf16.vlgmr.msra.gmra.mrb[24].mxu0 %vm494_vm2, %v722_v62  ;;  %2508 = vmatprep.subr.bf16.mxu1 %v2786_v32  ;;  %v466_v53 = vmax.f32 %v3052_v51, 0.0 }
 0x117   :  { %2499 = vmatpush3.bf16.msra.mxu0 %v2722_v60  ;;  %2502 = vmatprep.mubr.msk.bf16.mxu0 %vm2787_vm1, %v2786_v32 }
 0x118   :  { %2500 = vmatprep.subr.bf16.mxu0 %v2786_v32  ;;  %v470_v55 = vpack.c.bf16 %v466_v53, %v466_v53 }
 0x119   :  { %2509 = vmatpush3.bf16.msra.mxu1 %v2723_v0 }
 0x11a   :  { %2522 = vmatprep.subr.bf16.mxu1 %v2786_v32 }
 0x11b   :  { %2501 = vmatpush3.bf16.msra.mxu0 %v2724_v1 }
 0x11c   :  { %2511 = vmatmul.mubr.msk.bf16.vlgmr.msra.gmra.mrb[28].mxu1 %vm494_vm2, %v908_v3  ;;  %2514 = vmatprep.subr.bf16.mxu0 %v2786_v32 }
 0x11d   :  { %2523 = vmatpush3.bf16.msra.mxu1 %v2725_v2  ;;  %2526 = vmatprep.mubr.msk.bf16.mxu1 %vm2787_vm1, %v2786_v32 }
 0x11e   :  { %2503 = vmatmul.mubr.msk.bf16.vlgmr.msra.gmra.mrb[28].mxu0 %vm494_vm2, %v846_v5  ;;  %2524 = vmatprep.subr.bf16.mxu1 %v2786_v32 }
 0x11f   :  { %2515 = vmatpush3.bf16.msra.mxu0 %v2726_v4  ;;  %2518 = vmatprep.mubr.msk.bf16.mxu0 %vm2787_vm1, %v2786_v32 }
 0x120   :  { %2516 = vmatprep.subr.bf16.mxu0 %v2786_v32 }
 0x121   :  { %2525 = vmatpush3.bf16.msra.mxu1 %v2727_v6 }
 0x122   :  { %2538 = vmatprep.subr.bf16.mxu1 %v2786_v32 }
 0x123   :  { %2517 = vmatpush3.bf16.msra.mxu0 %v2728_v7 }
 0x124   :  { %2527 = vmatmul.mubr.msk.bf16.vlgmr.msra.gmra.mrb[32].mxu1 %vm494_vm2, %v1032_v8  ;;  %2530 = vmatprep.subr.bf16.mxu0 %v2786_v32 }
 0x125   :  { %2539 = vmatpush3.bf16.msra.mxu1 %v2729_v9  ;;  %2542 = vmatprep.mubr.msk.bf16.mxu1 %vm2787_vm1, %v2786_v32 }
 0x126   :  { %2519 = vmatmul.mubr.msk.bf16.vlgmr.msra.gmra.mrb[32].mxu0 %vm494_vm2, %v3014_v37  ;;  %2540 = vmatprep.subr.bf16.mxu1 %v2786_v32  ;;  %v2749_v37 = vld [vmem:[%s3302_s3 + $0x150] sm:$0xff]  }
 0x127   :  { %2531 = vmatpush3.bf16.msra.mxu0 %v2730_v10  ;;  %2534 = vmatprep.mubr.msk.bf16.mxu0 %vm2787_vm1, %v2786_v32 }
 0x128   :  { %2532 = vmatprep.subr.bf16.mxu0 %v2786_v32 }
 0x129   :  { %2541 = vmatpush3.bf16.msra.mxu1 %v2731_v11 }
 0x12a   :  { %2554 = vmatprep.subr.bf16.mxu1 %v2786_v32 }
 0x12b   :  { %2533 = vmatpush3.bf16.msra.mxu0 %v2732_v12 }
 0x12c   :  { %2543 = vmatmul.mubr.msk.bf16.vlgmr.msra.gmra.mrb[36].mxu1 %vm494_vm2, %v1156_v14  ;;  %2546 = vmatprep.subr.bf16.mxu0 %v2786_v32 }
 0x12d   :  { %2555 = vmatpush3.bf16.msra.mxu1 %v2733_v13  ;;  %2558 = vmatprep.mubr.msk.bf16.mxu1 %vm2787_vm1, %v2786_v32 }
 0x12e   :  { %2535 = vmatmul.mubr.msk.bf16.vlgmr.msra.gmra.mrb[36].mxu0 %vm494_vm2, %v1094_v16  ;;  %2556 = vmatprep.subr.bf16.mxu1 %v2786_v32 }
 0x12f   :  { %2547 = vmatpush3.bf16.msra.mxu0 %v2734_v15  ;;  %2550 = vmatprep.mubr.msk.bf16.mxu0 %vm2787_vm1, %v2786_v32 }
 0x130   :  { %2548 = vmatprep.subr.bf16.mxu0 %v2786_v32 }
 0x131   :  { %2557 = vmatpush3.bf16.msra.mxu1 %v2735_v17 }
 0x132   :  { %2570 = vmatprep.subr.bf16.mxu1 %v2786_v32 }
 0x133   :  { %2549 = vmatpush3.bf16.msra.mxu0 %v2736_v18 }
 0x134   :  { %2559 = vmatmul.mubr.msk.bf16.vlgmr.msra.gmra.mrb[40].mxu1 %vm494_vm2, %v1280_v20  ;;  %2562 = vmatprep.subr.bf16.mxu0 %v2786_v32 }
 0x135   :  { %2571 = vmatpush3.bf16.msra.mxu1 %v2737_v19  ;;  %2574 = vmatprep.mubr.msk.bf16.mxu1 %vm2787_vm1, %v2786_v32 }
 0x136   :  { %2551 = vmatmul.mubr.msk.bf16.vlgmr.msra.gmra.mrb[40].mxu0 %vm494_vm2, %v1218_v22  ;;  %2572 = vmatprep.subr.bf16.mxu1 %v2786_v32 }
 0x137   :  { %2563 = vmatpush3.bf16.msra.mxu0 %v2738_v21  ;;  %2566 = vmatprep.mubr.msk.bf16.mxu0 %vm2787_vm1, %v2786_v32 }
 0x138   :  { %2564 = vmatprep.subr.bf16.mxu0 %v2786_v32 }
 0x139   :  { %2573 = vmatpush3.bf16.msra.mxu1 %v2739_v23 }
 0x13a   :  { %2586 = vmatprep.subr.bf16.mxu1 %v2786_v32 }
 0x13b   :  { %2565 = vmatpush3.bf16.msra.mxu0 %v2740_v24 }
 0x13c   :  { %2575 = vmatmul.mubr.msk.bf16.vlgmr.msra.gmra.mrb[44].mxu1 %vm494_vm2, %v1404_v26  ;;  %2578 = vmatprep.subr.bf16.mxu0 %v2786_v32 }
 0x13d   :  { %2587 = vmatpush3.bf16.msra.mxu1 %v2741_v25  ;;  %2590 = vmatprep.mubr.msk.bf16.mxu1 %vm2787_vm1, %v2786_v32 }
 0x13e   :  { %2567 = vmatmul.mubr.msk.bf16.vlgmr.msra.gmra.mrb[44].mxu0 %vm494_vm2, %v1342_v28  ;;  %2588 = vmatprep.subr.bf16.mxu1 %v2786_v32 }
 0x13f   :  { %2579 = vmatpush3.bf16.msra.mxu0 %v2742_v27  ;;  %2582 = vmatprep.mubr.msk.bf16.mxu0 %vm2787_vm1, %v2786_v32 }
 0x140   :  { %2580 = vmatprep.subr.bf16.mxu0 %v2786_v32 }
 0x141   :  { %2589 = vmatpush3.bf16.msra.mxu1 %v2743_v29 }
 0x142   :  { %2602 = vmatprep.subr.bf16.mxu1 %v2786_v32 }
 0x143   :  { %2581 = vmatpush3.bf16.msra.mxu0 %v2744_v30 }
 0x144   :  { %2591 = vmatmul.mubr.msk.bf16.vlgmr.msra.gmra.mrb[48].mxu1 %vm494_vm2, %v1528_v31  ;;  %2594 = vmatprep.subr.bf16.mxu0 %v2786_v32 }
 0x145   :  { %2603 = vmatpush3.bf16.msra.mxu1 %v2745_v33  ;;  %2606 = vmatprep.mubr.msk.bf16.mxu1 %vm2787_vm1, %v2786_v32 }
 0x146   :  { %2583 = vmatmul.mubr.msk.bf16.vlgmr.msra.gmra.mrb[48].mxu0 %vm494_vm2, %v3038_v57  ;;  %2604 = vmatprep.subr.bf16.mxu1 %v2786_v32  ;;  %v2760_v57 = vld [vmem:[%s3304_s5 + $0x8] sm:$0xff]  }
 0x147   :  { %2595 = vmatpush3.bf16.msra.mxu0 %v2746_v34  ;;  %2598 = vmatprep.mubr.msk.bf16.mxu0 %vm2787_vm1, %v2786_v32 }
 0x148   :  { %2596 = vmatprep.subr.bf16.mxu0 %v2786_v32 }
 0x149   :  { %2605 = vmatpush3.bf16.msra.mxu1 %v2747_v35 }
 0x14a   :  { %2618 = vmatprep.subr.bf16.mxu1 %v2786_v32 }
 0x14b   :  { %2597 = vmatpush3.bf16.msra.mxu0 %v2748_v36 }
 0x14c   :  { %2607 = vmatmul.mubr.msk.bf16.vlgmr.msra.gmra.mrb[52].mxu1 %vm494_vm2, %v1652_v38  ;;  %2610 = vmatprep.subr.bf16.mxu0 %v2786_v32 }
 0x14d   :  { %2619 = vmatpush3.bf16.msra.mxu1 %v2749_v37  ;;  %2622 = vmatprep.mubr.msk.bf16.mxu1 %vm2787_vm1, %v2786_v32 }
 0x14e   :  { %2599 = vmatmul.mubr.msk.bf16.vlgmr.msra.gmra.mrb[52].mxu0 %vm494_vm2, %v1590_v40  ;;  %2620 = vmatprep.subr.bf16.mxu1 %v2786_v32 }
 0x14f   :  { %2611 = vmatpush3.bf16.msra.mxu0 %v2750_v39  ;;  %2614 = vmatprep.mubr.msk.bf16.mxu0 %vm2787_vm1, %v2786_v32 }
 0x150   :  { %2612 = vmatprep.subr.bf16.mxu0 %v2786_v32 }
 0x151   :  { %2621 = vmatpush3.bf16.msra.mxu1 %v2751_v41 }
 0x152   :  { %2634 = vmatprep.subr.bf16.mxu1 %v2786_v32 }
 0x153   :  { %2613 = vmatpush3.bf16.msra.mxu0 %v2752_v42 }
 0x154   :  { %2623 = vmatmul.mubr.msk.bf16.vlgmr.msra.gmra.mrb[56].mxu1 %vm494_vm2, %v1776_v44  ;;  %2626 = vmatprep.subr.bf16.mxu0 %v2786_v32 }
 0x155   :  { %2635 = vmatpush3.bf16.msra.mxu1 %v2753_v43  ;;  %2638 = vmatprep.mubr.msk.bf16.mxu1 %vm2787_vm1, %v2786_v32 }
 0x156   :  { %2615 = vmatmul.mubr.msk.bf16.vlgmr.msra.gmra.mrb[56].mxu0 %vm494_vm2, %v1714_v46  ;;  %2636 = vmatprep.subr.bf16.mxu1 %v2786_v32 }
 0x157   :  { %2627 = vmatpush3.bf16.msra.mxu0 %v2754_v45  ;;  %2630 = vmatprep.mubr.msk.bf16.mxu0 %vm2787_vm1, %v2786_v32 }
 0x158   :  { %2628 = vmatprep.subr.bf16.mxu0 %v2786_v32 }
 0x159   :  { %2637 = vmatpush3.bf16.msra.mxu1 %v2755_v47 }
 0x15a   :  { %2650 = vmatprep.subr.bf16.mxu1 %v2786_v32 }
 0x15b   :  { %2629 = vmatpush3.bf16.msra.mxu0 %v2756_v48 }
 0x15c   :  { %2639 = vmatmul.mubr.msk.bf16.vlgmr.msra.gmra.mrb[60].mxu1 %vm494_vm2, %v1900_v49  ;;  %2642 = vmatprep.subr.bf16.mxu0 %v2786_v32 }
 0x15d   :  { %2654 = vmatprep.mubr.msk.bf16.mxu1 %vm2787_vm1, %v2786_v32  ;;  %2651 = vmatpush3.bf16.msra.mxu1 %v2759_v56 }
 0x15e   :  { %2631 = vmatmul.mubr.msk.bf16.vlgmr.msra.gmra.mrb[60].mxu0 %vm494_vm2, %v1838_v52  ;;  %2652 = vmatprep.subr.bf16.mxu1 %v2786_v32 }
 0x15f   :  { %2643 = vmatpush3.bf16.msra.mxu0 %v2757_v50  ;;  %2646 = vmatprep.mubr.msk.bf16.mxu0 %vm2787_vm1, %v2786_v32 }
 0x160   :  { %2644 = vmatprep.subr.bf16.mxu0 %v2786_v32 }
 0x161   :  { %2653 = vmatpush3.bf16.msra.mxu1 %v2760_v57 }
 0x163   :  { %2645 = vmatpush3.bf16.msra.mxu0 %v2758_v54 }
 0x166   :  { %2647 = vmatmul.mubr.msk.bf16.vlgmr.msra.gmra.mrb[64].mxu0 %vm494_vm2, %v470_v55 }
 0x1d7   :  { %v587_v58 = vpop.f32.mrb[16].mxu1 }
 0x1d8   :  { %v2464_v59 = vpop.f32.mrb[17].mxu1 }
 0x1d9   :  { %v532_v60 = vpop.f32.mrb[16].mxu0  ;;  %v590_v61 = vpop.f32.mrb[18].mxu1 }
 0x1da   :  { %v588_v62 = vadd.f32 %v587_v58, %v532_v60  ;;  %v2456_v63 = vpop.f32.mrb[17].mxu0  ;;  %v2465_v0 = vpop.f32.mrb[19].mxu1 }
 0x1db   :  { %v535_v51 = vpop.f32.mrb[18].mxu0 }
 0x1dc   :  { %v2457_v1 = vpop.f32.mrb[19].mxu0 }
 0x1df   :  { %v710_v2 = vpop.f32.mrb[20].mxu1 }
 0x1e0   :  { %v2480_v3 = vpop.f32.mrb[21].mxu1 }
 0x1e1   :  { %v648_v4 = vpop.f32.mrb[20].mxu0  ;;  %v713_v5 = vpop.f32.mrb[22].mxu1 }
 0x1e2   :  { %v654_v6 = vadd.f32 %v648_v4, %v588_v62  ;;  %v2472_v32 = vpop.f32.mrb[21].mxu0  ;;  %v2481_v7 = vpop.f32.mrb[23].mxu1 }
 0x1e3   :  { %v651_v8 = vpop.f32.mrb[22].mxu0 }
 0x1e4   :  { %v2473_v9 = vpop.f32.mrb[23].mxu0  ;;  %v716_v10 = vadd.f32 %v710_v2, %v654_v6 }
 0x1e7   :  { %v834_v11 = vpop.f32.mrb[24].mxu1 }
 0x1e8   :  { %v2496_v12 = vpop.f32.mrb[25].mxu1 }
 0x1e9   :  { %v772_v13 = vpop.f32.mrb[24].mxu0  ;;  %v837_v14 = vpop.f32.mrb[26].mxu1 }
 0x1ea   :  { %v778_v15 = vadd.f32 %v772_v13, %v716_v10  ;;  %v2488_v16 = vpop.f32.mrb[25].mxu0  ;;  %v2497_v17 = vpop.f32.mrb[27].mxu1 }
 0x1eb   :  { %v775_v18 = vpop.f32.mrb[26].mxu0 }
 0x1ec   :  { %v2489_v19 = vpop.f32.mrb[27].mxu0  ;;  %v840_v20 = vadd.f32 %v834_v11, %v778_v15 }
 0x1ef   :  { %v958_v21 = vpop.f32.mrb[28].mxu1 }
 0x1f0   :  { %v2512_v22 = vpop.f32.mrb[29].mxu1 }
 0x1f1   :  { %v896_v23 = vpop.f32.mrb[28].mxu0  ;;  %v961_v24 = vpop.f32.mrb[30].mxu1 }
 0x1f2   :  { %v902_v25 = vadd.f32 %v896_v23, %v840_v20  ;;  %v2504_v26 = vpop.f32.mrb[29].mxu0  ;;  %v2513_v27 = vpop.f32.mrb[31].mxu1 }
 0x1f3   :  { %v899_v28 = vpop.f32.mrb[30].mxu0 }
 0x1f4   :  { %v2505_v29 = vpop.f32.mrb[31].mxu0  ;;  %v964_v30 = vadd.f32 %v958_v21, %v902_v25 }
 0x1f7   :  { %v1082_v31 = vpop.f32.mrb[32].mxu1 }
 0x1f8   :  { %v2528_v33 = vpop.f32.mrb[33].mxu1 }
 0x1f9   :  { %v1019_v34 = vpop.f32.mrb[32].mxu0  ;;  %v1085_v35 = vpop.f32.mrb[34].mxu1 }
 0x1fa   :  { %v1025_v36 = vadd.f32 %v1019_v34, %v964_v30  ;;  %v2520_v37 = vpop.f32.mrb[33].mxu0  ;;  %v2529_v38 = vpop.f32.mrb[35].mxu1 }
 0x1fb   :  { %v1022_v39 = vpop.f32.mrb[34].mxu0 }
 0x1fc   :  { %v2521_v40 = vpop.f32.mrb[35].mxu0  ;;  %v1088_v41 = vadd.f32 %v1082_v31, %v1025_v36 }
 0x1ff   :  { %v1206_v42 = vpop.f32.mrb[36].mxu1 }
 0x200   :  { %v2544_v43 = vpop.f32.mrb[37].mxu1 }
 0x201   :  { %v1144_v44 = vpop.f32.mrb[36].mxu0  ;;  %v1209_v45 = vpop.f32.mrb[38].mxu1 }
 0x202   :  { %v1150_v46 = vadd.f32 %v1144_v44, %v1088_v41  ;;  %v2536_v47 = vpop.f32.mrb[37].mxu0  ;;  %v2545_v48 = vpop.f32.mrb[39].mxu1 }
 0x203   :  { %v1147_v49 = vpop.f32.mrb[38].mxu0 }
 0x204   :  { %v2537_v50 = vpop.f32.mrb[39].mxu0  ;;  %v1212_v52 = vadd.f32 %v1206_v42, %v1150_v46  ;;  %v2327_v49 = vld [vmem:[%s3303_s4] ss:$0 sm:$0xff]  ;;  %s2761_s4 = scalar_lea.vmem %s2103_s14, 32 }
 0x205   :  { %p2762_p0 = scmp.ne.s32.totalorder %s2103_s14, %s2761_s4  ;;  %p2767_p2 = scmp.lt.s32.totalorder %s2761_s4, %s2761_s4 }
 0x207   :  { %v1330_v53 = vpop.f32.mrb[40].mxu1  ;;  %p2768_p3 = por %p2767_p2, %p2766_p1 }
 0x208   :  { %v2560_v54 = vpop.f32.mrb[41].mxu1 }
 0x209   :  { %v1268_v55 = vpop.f32.mrb[40].mxu0  ;;  %v1333_v56 = vpop.f32.mrb[42].mxu1  ;;  %p2769_p4 = pnand %p2768_p3, %p2762_p0 }
 0x20a   :  { %v1274_v57 = vadd.f32 %v1268_v55, %v1212_v52  ;;  %v2552_v58 = vpop.f32.mrb[41].mxu0  ;;  %v2561_v59 = vpop.f32.mrb[43].mxu1 }
 0x20b   :  { %v1271_v60 = vpop.f32.mrb[42].mxu0  ;;  %v2328_v58 = vld [vmem:[%s3305_s6] ss:$0 sm:$0xff] }
 0x20c   :  { %v2553_v61 = vpop.f32.mrb[43].mxu0  ;;  %v1336_v62 = vadd.f32 %v1330_v53, %v1274_v57 }
 0x20f   :  { %v1454_v63 = vpop.f32.mrb[44].mxu1 }
 0x210   :  { %v2576_v0 = vpop.f32.mrb[45].mxu1 }
 0x211   :  { %v1392_v51 = vpop.f32.mrb[44].mxu0  ;;  %v1457_v1 = vpop.f32.mrb[46].mxu1 }
 0x212   :  { %v1398_v2 = vadd.f32 %v1392_v51, %v1336_v62  ;;  %v2568_v3 = vpop.f32.mrb[45].mxu0  ;;  %v2577_v4 = vpop.f32.mrb[47].mxu1 }
 0x213   :  { %v1395_v5 = vpop.f32.mrb[46].mxu0 }
 0x214   :  { %v2569_v6 = vpop.f32.mrb[47].mxu0  ;;  %v1460_v32 = vadd.f32 %v1454_v63, %v1398_v2 }
 0x217   :  { %v1578_v7 = vpop.f32.mrb[48].mxu1 }
 0x218   :  { %v2592_v8 = vpop.f32.mrb[49].mxu1 }
 0x219   :  { %v1515_v9 = vpop.f32.mrb[48].mxu0  ;;  %v1581_v10 = vpop.f32.mrb[50].mxu1 }
 0x21a   :  { %v1521_v11 = vadd.f32 %v1515_v9, %v1460_v32  ;;  %v2584_v12 = vpop.f32.mrb[49].mxu0  ;;  %v2593_v13 = vpop.f32.mrb[51].mxu1 }
 0x21b   :  { %v1518_v14 = vpop.f32.mrb[50].mxu0 }
 0x21c   :  { %v2585_v15 = vpop.f32.mrb[51].mxu0  ;;  %v1584_v16 = vadd.f32 %v1578_v7, %v1521_v11 }
 0x21f   :  { %v1702_v17 = vpop.f32.mrb[52].mxu1 }
 0x220   :  { %v2608_v18 = vpop.f32.mrb[53].mxu1 }
 0x221   :  { %v1640_v19 = vpop.f32.mrb[52].mxu0  ;;  %v1705_v20 = vpop.f32.mrb[54].mxu1 }
 0x222   :  { %v1646_v21 = vadd.f32 %v1640_v19, %v1584_v16  ;;  %v2600_v22 = vpop.f32.mrb[53].mxu0  ;;  %v2609_v23 = vpop.f32.mrb[55].mxu1 }
 0x223   :  { %v1643_v24 = vpop.f32.mrb[54].mxu0 }
 0x224   :  { %v2601_v25 = vpop.f32.mrb[55].mxu0  ;;  %v1708_v26 = vadd.f32 %v1702_v17, %v1646_v21 }
 0x227   :  { %v1826_v27 = vpop.f32.mrb[56].mxu1 }
 0x228   :  { %v2624_v28 = vpop.f32.mrb[57].mxu1 }
 0x229   :  { %v1764_v29 = vpop.f32.mrb[56].mxu0  ;;  %v1829_v30 = vpop.f32.mrb[58].mxu1 }
 0x22a   :  { %v1770_v31 = vadd.f32 %v1764_v29, %v1708_v26  ;;  %v2616_v33 = vpop.f32.mrb[57].mxu0  ;;  %v2625_v34 = vpop.f32.mrb[59].mxu1 }
 0x22b   :  { %v1767_v35 = vpop.f32.mrb[58].mxu0 }
 0x22c   :  { %v2617_v36 = vpop.f32.mrb[59].mxu0  ;;  %v1832_v37 = vadd.f32 %v1826_v27, %v1770_v31 }
 0x22f   :  { %v1950_v38 = vpop.f32.mrb[60].mxu1 }
 0x230   :  { %v2640_v39 = vpop.f32.mrb[61].mxu1 }
 0x231   :  { %v1888_v40 = vpop.f32.mrb[60].mxu0  ;;  %v1953_v41 = vpop.f32.mrb[62].mxu1 }
 0x232   :  { %v1894_v42 = vadd.f32 %v1888_v40, %v1832_v37  ;;  %v2632_v43 = vpop.f32.mrb[61].mxu0  ;;  %v2641_v44 = vpop.f32.mrb[63].mxu1 }
 0x233   :  { %v1891_v45 = vpop.f32.mrb[62].mxu0 }
 0x234   :  { %v2633_v46 = vpop.f32.mrb[63].mxu0  ;;  %v1956_v47 = vadd.f32 %v1950_v38, %v1894_v42 }
 0x239   :  { %v2011_v48 = vpop.f32.mrb[64].mxu0 }
 0x23a   :  { %v2017_v50 = vadd.f32 %v2011_v48, %v1956_v47  ;;  %v2648_v52 = vpop.f32.mrb[65].mxu0 }
 0x23b   :  { %v2014_v53 = vpop.f32.mrb[66].mxu0 }
 0x23c   :  { %v2025_v54 = vadd.f32 %v2327_v49, %v2017_v50  ;;  %v2649_v55 = vpop.f32.mrb[67].mxu0 }
 0x23e   :  { %v2026_v56 = vmax.f32 %v2025_v54, 0.0 }
 0x240   :  { %v2027_v57 = vpack.c.bf16 %v2026_v56, %v2026_v56 }
 0x242   :  { %2655 = vmatmul.mubr.msk.bf16.vlgmr.msra.gmra.mrb[64].mxu1 %vm494_vm2, %v2027_v57 }
 0x315   :  { %v2088_v59 = vpop.f32.mrb[64].mxu1 }
 0x316   :  { %v2089_v60 = vadd.f32 %v2328_v58, %v2088_v59  ;;  %v2656_v61 = vpop.f32.mrb[65].mxu1 }
 0x317   :  { %v2091_v62 = vpop.f32.mrb[66].mxu1 }
 0x318   :  { %v2657_v63 = vpop.f32.mrb[67].mxu1  ;;  %2095 = vst.msk [vmem:[#allocation2] sm:$0x3] %vm2094_vm3, %v2089_v60 }
 0x319   :  { %2772 = shalt.err (!%p2769_p4)
}
 0x31a   :  { %s2773_s6 = scalar_lea.hbm %s3306_s7, 32 }
 0x31b   :  { %p2774_p5 = scmp.ne.s32.totalorder %s3306_s7, %s2773_s6  ;;  %p2777_p6 = scmp.lt.u32.totalorder %s2773_s6, %s3306_s7 }
 0x31d   :  { %p2779_p7 = pnand %p2777_p6, %p2774_p5 }
 0x31f   :  { %2782 = shalt.err (!%p2779_p7)
}
 0x320   :  { %2105 = dma.vmem_to_hbm [thread:$0]  %s2103_s14, 32, %s3306_s7, [#allocation3]  }
 0x321   :  { %2783 = dma.done.wait [#allocation3], 32  }
 0x322   :  { %2784 = vsyncadd [#allocation3], 4294967264 }
 0x323   :  { %2109 = vsyncpa [#allocation3], 1 }

</bundles_post_ra>
